<compile_context>
chip_gen: v7x
topology: tpu7x:2x2x1
jax: 0.10.0
libtpu: 0.0.40
codegen_flags: <defaults>
</compile_context>

<pallas_src>
import functools

import jax
import jax.numpy as jnp
from jax.experimental import pallas as pl
from jax.experimental.pallas import tpu as pltpu


# ----------------------------------------------------------------------------
# Tile / padding plan
# ----------------------------------------------------------------------------
_K_SINGLE_MAX = 2304              # <= 9*256 reduction depth -> single K step
_VMEM_LIMIT = 48 * 1024 * 1024    # explicit scoped-VMEM budget (v5e/v6e/v7x safe)


def _round_up(x, m):
    return (x + m - 1) // m * m


def _k_co_pad(K, Co):
    """Padded (K, Co) for the weight matrices; computed once at prepare time."""
    k_pad = K if K <= _K_SINGLE_MAX else _round_up(K, 512)
    co_pad = _round_up(Co, 128)   # lane-dense output channels (unmasked vst)
    return k_pad, co_pad


# ----------------------------------------------------------------------------
# Pallas kernel: tiled (patches @ W_scaled) [+ residual] [+ ReLU]
# f32 VMEM accumulator over the K grid axis, initialised with the folded bias.
# ----------------------------------------------------------------------------
def _matmul_bias_kernel(*refs, apply_relu, add_residual):
    if add_residual:
        p_ref, w_ref, b_ref, r_ref, o_ref, acc_ref = refs
    else:
        p_ref, w_ref, b_ref, o_ref, acc_ref = refs
        r_ref = None

    k = pl.program_id(2)

    @pl.when(k == 0)
    def _():
        # Init accumulator with the folded-BN bias (scale is folded into W).
        acc_ref[...] = jnp.broadcast_to(b_ref[...], acc_ref.shape).astype(jnp.float32)

    acc_ref[...] += jnp.dot(
        p_ref[...], w_ref[...], preferred_element_type=jnp.float32
    )

    @pl.when(k == pl.num_programs(2) - 1)
    def _():
        out = acc_ref[...]
        if r_ref is not None:
            out = out + r_ref[...].astype(jnp.float32)   # residual / shortcut
        if apply_relu:
            out = jnp.maximum(out, 0.0)
        o_ref[...] = out.astype(o_ref.dtype)


def fused_matmul_bias(patches, w_padded, bias_row, residual=None,
                      apply_relu=True, out_dtype=jnp.bfloat16):
    """patches: (M, K) bf16; w_padded: (k_pad, co_pad) bf16 with BN scale folded;
    bias_row: (1, co_pad) f32; residual: optional (M or m_pad, co_pad) bf16.
    Returns the PADDED (m_pad, co_pad) result (lane-dense handoff)."""
    M, K = patches.shape
    k_pad, co_pad = w_padded.shape

    # Tile plan (tiles chosen first, then pad).  On v7x the M grid axis is the
    # megacore axis when co_pad <= 512, so large M keeps both TCs busy.
    tm = min(512, _round_up(M, 16))
    m_pad = _round_up(M, tm)
    tk = k_pad if k_pad <= _K_SINGLE_MAX else 512
    tn = min(512, co_pad)

    p = patches
    if (m_pad, k_pad) != (M, K):
        p = jnp.pad(p, ((0, m_pad - M), (0, k_pad - K)))

    args = [p, w_padded, bias_row]
    in_specs = [
        pl.BlockSpec((tm, tk), lambda i, j, k: (i, k)),
        pl.BlockSpec((tk, tn), lambda i, j, k: (k, j)),
        pl.BlockSpec((1, tn), lambda i, j, k: (0, j)),
    ]
    add_residual = residual is not None
    if add_residual:
        assert residual.shape[1] == co_pad
        r = residual.astype(jnp.bfloat16)
        if r.shape[0] != m_pad:
            r = jnp.pad(r, ((0, m_pad - r.shape[0]), (0, 0)))
        args.append(r)
        in_specs.append(pl.BlockSpec((tm, tn), lambda i, j, k: (i, j)))

    kernel = functools.partial(
        _matmul_bias_kernel, apply_relu=apply_relu, add_residual=add_residual
    )
    out = pl.pallas_call(
        kernel,
        out_shape=jax.ShapeDtypeStruct((m_pad, co_pad), out_dtype),
        grid=(m_pad // tm, co_pad // tn, k_pad // tk),
        in_specs=in_specs,
        out_specs=pl.BlockSpec((tm, tn), lambda i, j, k: (i, j)),
        scratch_shapes=[pltpu.VMEM((tm, tn), jnp.float32)],
        compiler_params=pltpu.CompilerParams(
            dimension_semantics=("parallel", "parallel", "arbitrary"),
            vmem_limit_bytes=_VMEM_LIMIT,
        ),
    )(*args)
    return out


# ----------------------------------------------------------------------------
# JAX glue: im2col (bf16), parameter prep (BN folding + padded weight layout)
# ----------------------------------------------------------------------------
def im2col_3x3(x, stride):
    """x: (N, H, W, C) NHWC bf16, kernel=3, padding=1. Returns (N*Ho*Wo, 9*C)."""
    N, H, W, C = x.shape
    Ho = (H + 2 - 3) // stride + 1
    Wo = (W + 2 - 3) // stride + 1
    xp = jnp.pad(x, ((0, 0), (1, 1), (1, 1), (0, 0)))
    cols = []
    for kh in range(3):
        for kw in range(3):
            cols.append(
                xp[:,
                   kh:kh + stride * (Ho - 1) + 1:stride,
                   kw:kw + stride * (Wo - 1) + 1:stride,
                   :]
            )
    patches = jnp.concatenate(cols, axis=-1)   # (N, Ho, Wo, 9*C); [kh, kw, C]
    return patches.reshape(N * Ho * Wo, 9 * C), (N, Ho, Wo)


def init_bn(key, c):
    k1, k2, k3, k4 = jax.random.split(key, 4)
    gamma = 1.0 + 0.1 * jax.random.normal(k1, (c,), jnp.float32)
    beta = 0.1 * jax.random.normal(k2, (c,), jnp.float32)
    mean = 0.1 * jax.random.normal(k3, (c,), jnp.float32)
    var = jax.random.uniform(k4, (c,), jnp.float32, 0.5, 1.5)
    return (gamma, beta, mean, var)


def init_params(key, in_planes, planes, stride):
    ks = jax.random.split(key, 8)
    params = {
        "conv1_w": 0.1 * jax.random.normal(ks[0], (planes, in_planes, 3, 3), jnp.float32),
        "bn1": init_bn(ks[1], planes),
        "conv2_w": 0.1 * jax.random.normal(ks[2], (planes, planes, 3, 3), jnp.float32),
        "bn2": init_bn(ks[3], planes),
    }
    if stride != 1 or in_planes != planes:
        params["convs_w"] = 0.1 * jax.random.normal(
            ks[4], (planes, in_planes, 1, 1), jnp.float32
        )
        params["bns"] = init_bn(ks[5], planes)
    return params


def prepare_block_params(params, eps=1e-5):
    """One-time prep: fold BN (inference stats) into each conv's weight columns
    and bias, transpose to the (K, Co) matmul layout matching the im2col
    [kh, kw, Cin] ordering, and zero-pad to the kernel's (k_pad, co_pad) tiles.
    conv2's rows are per-tap channel-padded so it consumes conv1's lane-dense
    (channel-padded) output directly."""
    def fold(w_oihw, bn, in_ch_pad=None):
        gamma, beta, mean, var = bn
        scale = gamma / jnp.sqrt(var + eps)
        bias = beta - mean * scale
        co, ci, kh, kw = w_oihw.shape
        w = jnp.transpose(w_oihw, (2, 3, 1, 0)) * scale       # (kh, kw, ci, co)
        if in_ch_pad is not None and in_ch_pad > ci:
            w = jnp.pad(w, ((0, 0), (0, 0), (0, in_ch_pad - ci), (0, 0)))
            ci = in_ch_pad
        K = kh * kw * ci
        k_pad, co_pad = _k_co_pad(K, co)
        w_mat = jnp.pad(w.reshape(K, co), ((0, k_pad - K), (0, co_pad - co)))
        b_row = jnp.pad(bias, (0, co_pad - co)).reshape(1, co_pad)
        return w_mat.astype(jnp.bfloat16), b_row.astype(jnp.float32)

    prepped = {}
    prepped["w1"], prepped["b1"] = fold(params["conv1_w"], params["bn1"])
    c1_pad = prepped["b1"].shape[1]
    prepped["w2"], prepped["b2"] = fold(params["conv2_w"], params["bn2"],
                                        in_ch_pad=c1_pad)
    if "convs_w" in params:
        prepped["ws"], prepped["bs"] = fold(params["convs_w"], params["bns"])
    return prepped


# ----------------------------------------------------------------------------
# BasicBlock forward (matches the PyTorch module; BN in inference mode)
# ----------------------------------------------------------------------------
def basic_block_forward(x_nchw, prepped, stride, planes):
    # NCHW f32 -> NHWC bf16 (single fused transpose+cast pass under jit).
    # TODO(synk): when blocks are chained, keep NHWC bf16 end-to-end and skip
    # these wrapper transposes / the f32 final cast.
    x = jnp.transpose(x_nchw, (0, 2, 3, 1)).astype(jnp.bfloat16)
    N, H, W, Cin = x.shape
    c1_pad = prepped["b1"].shape[1]
    c2_pad = prepped["b2"].shape[1]

    # --- out1 = relu(bn1(conv1(x))) --- kept padded / lane-dense, bf16.
    p1, (n, ho, wo) = im2col_3x3(x, stride)
    M = n * ho * wo
    out1 = fused_matmul_bias(p1, prepped["w1"], prepped["b1"], apply_relu=True)
    if out1.shape[0] != M:
        out1 = out1[:M]
    out1_nhwc = out1.reshape(n, ho, wo, c1_pad)

    # --- shortcut(x) --- (M, c2_pad) bf16, kept lane-dense.
    if "ws" in prepped:
        xs = x[:, ::stride, ::stride, :].reshape(M, Cin)
        shortcut = fused_matmul_bias(xs, prepped["ws"], prepped["bs"],
                                     apply_relu=False)
        if shortcut.shape[0] != M:
            shortcut = shortcut[:M]
    else:
        shortcut = x.reshape(M, Cin)
        if c2_pad != Cin:
            shortcut = jnp.pad(shortcut, ((0, 0), (0, c2_pad - Cin)))

    # --- out = relu(bn2(conv2(out1)) + shortcut) --- (f32 output like PyTorch).
    p2, _ = im2col_3x3(out1_nhwc, 1)
    out = fused_matmul_bias(p2, prepped["w2"], prepped["b2"], residual=shortcut,
                            apply_relu=True, out_dtype=jnp.float32)
    out = out[:M, :planes].reshape(n, ho, wo, planes)
    return jnp.transpose(out, (0, 3, 1, 2))   # back to NCHW


if __name__ == "__main__":
    key = jax.random.PRNGKey(0)
    kx, kp1, kp2 = jax.random.split(key, 3)

    fwd = jax.jit(basic_block_forward, static_argnames=("stride", "planes"))

    # Block with projection shortcut (stride=2, channel change).
    N, Cin, H, W = 2, 4, 16, 16
    planes, stride = 8, 2
    x = jax.random.normal(kx, (N, Cin, H, W), jnp.float32)
    params = init_params(kp1, Cin, planes, stride)
    prepped = prepare_block_params(params)
    out = fwd(x, prepped, stride=stride, planes=planes)
    out = jax.block_until_ready(out)
    assert out.shape == (N, planes, H // stride, W // stride)

    # Block with identity shortcut (stride=1, in_planes == planes).
    params_id = init_params(kp2, planes, planes, 1)
    prepped_id = prepare_block_params(params_id)
    out2 = fwd(out, prepped_id, stride=1, planes=planes)
    out2 = jax.block_until_ready(out2)
    assert out2.shape == (N, planes, H // stride, W // stride)

    print("KERNEL_OK")
</pallas_src>

<mosaic_0001>
module attributes {stable_mosaic.version = 11 : i64} {
  func.func @_matmul_bias_kernel(%arg0: i32, %arg1: i32, %arg2: i32, %arg3: memref<128x36xbf16, #tpu.memory_space<vmem>>, %arg4: memref<36x128xbf16, #tpu.memory_space<vmem>>, %arg5: memref<1x128xf32, #tpu.memory_space<vmem>>, %arg6: memref<128x128xbf16, #tpu.memory_space<vmem>>, %arg7: memref<128x128xf32, #tpu.memory_space<vmem>>) attributes {dimension_semantics = [#tpu.dimension_semantics<parallel>, #tpu.dimension_semantics<parallel>, #tpu.dimension_semantics<arbitrary>], iteration_bounds = array<i64: 1, 1, 1>, scalar_prefetch = 0 : i64, scratch_operands = 1 : i64, tpu.core_type = #tpu.core_type<tc>, window_params = [{transform_indices = @transform_0, window_bounds = array<i64: 128, 36>}, {transform_indices = @transform_1, window_bounds = array<i64: 36, 128>}, {transform_indices = @transform_2, window_bounds = array<i64: 1, 128>}, {transform_indices = @transform_3, window_bounds = array<i64: 128, 128>}]} {
    %c0_i32 = arith.constant 0 : i32
    %0 = arith.cmpi eq, %arg2, %c0_i32 : i32
    %1 = arith.extui %0 : i1 to i32
    %c0_i32_0 = arith.constant 0 : i32
    %2 = arith.cmpi ne, %1, %c0_i32_0 : i32
    scf.if %2 {
      %c0_10 = arith.constant 0 : index
      %c0_11 = arith.constant 0 : index
      %12 = vector.load %arg5[%c0_10, %c0_11] : memref<1x128xf32, #tpu.memory_space<vmem>>, vector<1x128xf32>
      %13 = vector.shape_cast %12 : vector<1x128xf32> to vector<1x128xf32>
      %14 = vector.broadcast %13 : vector<1x128xf32> to vector<128x128xf32>
      %c0_12 = arith.constant 0 : index
      %c0_13 = arith.constant 0 : index
      %15 = vector.load %arg7[%c0_12, %c0_13] : memref<128x128xf32, #tpu.memory_space<vmem>>, vector<128x128xf32>
      tpu.vector_store %arg7[%c0_12, %c0_13], %14 {strides = array<i32>} : memref<128x128xf32, #tpu.memory_space<vmem>>, vector<128x128xf32>,
    } else {
    }
    %c0 = arith.constant 0 : index
    %c0_1 = arith.constant 0 : index
    %3 = vector.load %arg7[%c0, %c0_1] : memref<128x128xf32, #tpu.memory_space<vmem>>, vector<128x128xf32>
    %c0_2 = arith.constant 0 : index
    %c0_3 = arith.constant 0 : index
    %4 = vector.load %arg3[%c0_2, %c0_3] : memref<128x36xbf16, #tpu.memory_space<vmem>>, vector<128x36xbf16>
    %c0_4 = arith.constant 0 : index
    %c0_5 = arith.constant 0 : index
    %5 = vector.load %arg4[%c0_4, %c0_5] : memref<36x128xbf16, #tpu.memory_space<vmem>>, vector<36x128xbf16>
    %cst = arith.constant dense<0.000000e+00> : vector<128x128xf32>
    %6 = tpu.matmul %4, %5, %cst {dimension_numbers = #tpu.dot_dimension_numbers<[1], [0], [0], [1], [0, 0, 1, 1], [], []>} : vector<128x36xbf16>, vector<36x128xbf16>, vector<128x128xf32> -> vector<128x128xf32>
    %7 = arith.addf %3, %6 : vector<128x128xf32>
    %c0_6 = arith.constant 0 : index
    %c0_7 = arith.constant 0 : index
    %8 = vector.load %arg7[%c0_6, %c0_7] : memref<128x128xf32, #tpu.memory_space<vmem>>, vector<128x128xf32>
    tpu.vector_store %arg7[%c0_6, %c0_7], %7 {strides = array<i32>} : memref<128x128xf32, #tpu.memory_space<vmem>>, vector<128x128xf32>,
    %c0_i32_8 = arith.constant 0 : i32
    %9 = arith.cmpi eq, %arg2, %c0_i32_8 : i32
    %10 = arith.extui %9 : i1 to i32
    %c0_i32_9 = arith.constant 0 : i32
    %11 = arith.cmpi ne, %10, %c0_i32_9 : i32
    scf.if %11 {
      %c0_10 = arith.constant 0 : index
      %c0_11 = arith.constant 0 : index
      %12 = vector.load %arg7[%c0_10, %c0_11] : memref<128x128xf32, #tpu.memory_space<vmem>>, vector<128x128xf32>
      %cst_12 = arith.constant 0.000000e+00 : f32
      %13 = vector.broadcast %cst_12 : f32 to vector<128x128xf32>
      %14 = arith.maximumf %12, %13 : vector<128x128xf32>
      %15 = arith.truncf %14 : vector<128x128xf32> to vector<128x128xbf16>
      %c0_13 = arith.constant 0 : index
      %c0_14 = arith.constant 0 : index
      %16 = vector.load %arg6[%c0_13, %c0_14] : memref<128x128xbf16, #tpu.memory_space<vmem>>, vector<128x128xbf16>
      tpu.vector_store %arg6[%c0_13, %c0_14], %15 {strides = array<i32>} : memref<128x128xbf16, #tpu.memory_space<vmem>>, vector<128x128xbf16>,
    } else {
    }
    return
  }
  func.func @transform_0(%arg0: i32, %arg1: i32, %arg2: i32) -> (i32, i32) {
    %c0_i32 = arith.constant 0 : i32
    return %arg0, %arg2 : i32, i32
  }
  func.func @transform_1(%arg0: i32, %arg1: i32, %arg2: i32) -> (i32, i32) {
    %c0_i32 = arith.constant 0 : i32
    return %arg2, %arg1 : i32, i32
  }
  func.func @transform_2(%arg0: i32, %arg1: i32, %arg2: i32) -> (i32, i32) {
    %c0_i32 = arith.constant 0 : i32
    %c0_i32_0 = arith.constant 0 : i32
    return %c0_i32, %arg1 : i32, i32
  }
  func.func @transform_3(%arg0: i32, %arg1: i32, %arg2: i32) -> (i32, i32) {
    %c0_i32 = arith.constant 0 : i32
    return %arg0, %arg1 : i32, i32
  }
}

module attributes {stable_mosaic.version = 11 : i64} {
  func.func @_matmul_bias_kernel(%arg0: i32, %arg1: i32, %arg2: i32, %arg3: memref<128x4xbf16, #tpu.memory_space<vmem>>, %arg4: memref<4x128xbf16, #tpu.memory_space<vmem>>, %arg5: memref<1x128xf32, #tpu.memory_space<vmem>>, %arg6: memref<128x128xbf16, #tpu.memory_space<vmem>>, %arg7: memref<128x128xf32, #tpu.memory_space<vmem>>) attributes {dimension_semantics = [#tpu.dimension_semantics<parallel>, #tpu.dimension_semantics<parallel>, #tpu.dimension_semantics<arbitrary>], iteration_bounds = array<i64: 1, 1, 1>, scalar_prefetch = 0 : i64, scratch_operands = 1 : i64, tpu.core_type = #tpu.core_type<tc>, window_params = [{transform_indices = @transform_0, window_bounds = array<i64: 128, 4>}, {transform_indices = @transform_1, window_bounds = array<i64: 4, 128>}, {transform_indices = @transform_2, window_bounds = array<i64: 1, 128>}, {transform_indices = @transform_3, window_bounds = array<i64: 128, 128>}]} {
    %c0_i32 = arith.constant 0 : i32
    %0 = arith.cmpi eq, %arg2, %c0_i32 : i32
    %1 = arith.extui %0 : i1 to i32
    %c0_i32_0 = arith.constant 0 : i32
    %2 = arith.cmpi ne, %1, %c0_i32_0 : i32
    scf.if %2 {
      %c0_10 = arith.constant 0 : index
      %c0_11 = arith.constant 0 : index
      %12 = vector.load %arg5[%c0_10, %c0_11] : memref<1x128xf32, #tpu.memory_space<vmem>>, vector<1x128xf32>
      %13 = vector.shape_cast %12 : vector<1x128xf32> to vector<1x128xf32>
      %14 = vector.broadcast %13 : vector<1x128xf32> to vector<128x128xf32>
      %c0_12 = arith.constant 0 : index
      %c0_13 = arith.constant 0 : index
      %15 = vector.load %arg7[%c0_12, %c0_13] : memref<128x128xf32, #tpu.memory_space<vmem>>, vector<128x128xf32>
      tpu.vector_store %arg7[%c0_12, %c0_13], %14 {strides = array<i32>} : memref<128x128xf32, #tpu.memory_space<vmem>>, vector<128x128xf32>,
    } else {
    }
    %c0 = arith.constant 0 : index
    %c0_1 = arith.constant 0 : index
    %3 = vector.load %arg7[%c0, %c0_1] : memref<128x128xf32, #tpu.memory_space<vmem>>, vector<128x128xf32>
    %c0_2 = arith.constant 0 : index
    %c0_3 = arith.constant 0 : index
    %4 = vector.load %arg3[%c0_2, %c0_3] : memref<128x4xbf16, #tpu.memory_space<vmem>>, vector<128x4xbf16>
    %c0_4 = arith.constant 0 : index
    %c0_5 = arith.constant 0 : index
    %5 = vector.load %arg4[%c0_4, %c0_5] : memref<4x128xbf16, #tpu.memory_space<vmem>>, vector<4x128xbf16>
    %cst = arith.constant dense<0.000000e+00> : vector<128x128xf32>
    %6 = tpu.matmul %4, %5, %cst {dimension_numbers = #tpu.dot_dimension_numbers<[1], [0], [0], [1], [0, 0, 1, 1], [], []>} : vector<128x4xbf16>, vector<4x128xbf16>, vector<128x128xf32> -> vector<128x128xf32>
    %7 = arith.addf %3, %6 : vector<128x128xf32>
    %c0_6 = arith.constant 0 : index
    %c0_7 = arith.constant 0 : index
    %8 = vector.load %arg7[%c0_6, %c0_7] : memref<128x128xf32, #tpu.memory_space<vmem>>, vector<128x128xf32>
    tpu.vector_store %arg7[%c0_6, %c0_7], %7 {strides = array<i32>} : memref<128x128xf32, #tpu.memory_space<vmem>>, vector<128x128xf32>,
    %c0_i32_8 = arith.constant 0 : i32
    %9 = arith.cmpi eq, %arg2, %c0_i32_8 : i32
    %10 = arith.extui %9 : i1 to i32
    %c0_i32_9 = arith.constant 0 : i32
    %11 = arith.cmpi ne, %10, %c0_i32_9 : i32
    scf.if %11 {
      %c0_10 = arith.constant 0 : index
      %c0_11 = arith.constant 0 : index
      %12 = vector.load %arg7[%c0_10, %c0_11] : memref<128x128xf32, #tpu.memory_space<vmem>>, vector<128x128xf32>
      %13 = arith.truncf %12 : vector<128x128xf32> to vector<128x128xbf16>
      %c0_12 = arith.constant 0 : index
      %c0_13 = arith.constant 0 : index
      %14 = vector.load %arg6[%c0_12, %c0_13] : memref<128x128xbf16, #tpu.memory_space<vmem>>, vector<128x128xbf16>
      tpu.vector_store %arg6[%c0_12, %c0_13], %13 {strides = array<i32>} : memref<128x128xbf16, #tpu.memory_space<vmem>>, vector<128x128xbf16>,
    } else {
    }
    return
  }
  func.func @transform_0(%arg0: i32, %arg1: i32, %arg2: i32) -> (i32, i32) {
    %c0_i32 = arith.constant 0 : i32
    return %arg0, %arg2 : i32, i32
  }
  func.func @transform_1(%arg0: i32, %arg1: i32, %arg2: i32) -> (i32, i32) {
    %c0_i32 = arith.constant 0 : i32
    return %arg2, %arg1 : i32, i32
  }
  func.func @transform_2(%arg0: i32, %arg1: i32, %arg2: i32) -> (i32, i32) {
    %c0_i32 = arith.constant 0 : i32
    %c0_i32_0 = arith.constant 0 : i32
    return %c0_i32, %arg1 : i32, i32
  }
  func.func @transform_3(%arg0: i32, %arg1: i32, %arg2: i32) -> (i32, i32) {
    %c0_i32 = arith.constant 0 : i32
    return %arg0, %arg1 : i32, i32
  }
}

module attributes {stable_mosaic.version = 11 : i64} {
  func.func @_matmul_bias_kernel(%arg0: i32, %arg1: i32, %arg2: i32, %arg3: memref<128x1152xbf16, #tpu.memory_space<vmem>>, %arg4: memref<1152x128xbf16, #tpu.memory_space<vmem>>, %arg5: memref<1x128xf32, #tpu.memory_space<vmem>>, %arg6: memref<128x128xbf16, #tpu.memory_space<vmem>>, %arg7: memref<128x128xf32, #tpu.memory_space<vmem>>, %arg8: memref<128x128xf32, #tpu.memory_space<vmem>>) attributes {dimension_semantics = [#tpu.dimension_semantics<parallel>, #tpu.dimension_semantics<parallel>, #tpu.dimension_semantics<arbitrary>], iteration_bounds = array<i64: 1, 1, 1>, scalar_prefetch = 0 : i64, scratch_operands = 1 : i64, tpu.core_type = #tpu.core_type<tc>, window_params = [{transform_indices = @transform_0, window_bounds = array<i64: 128, 1152>}, {transform_indices = @transform_1, window_bounds = array<i64: 1152, 128>}, {transform_indices = @transform_2, window_bounds = array<i64: 1, 128>}, {transform_indices = @transform_3, window_bounds = array<i64: 128, 128>}, {transform_indices = @transform_4, window_bounds = array<i64: 128, 128>}]} {
    %c0_i32 = arith.constant 0 : i32
    %0 = arith.cmpi eq, %arg2, %c0_i32 : i32
    %1 = arith.extui %0 : i1 to i32
    %c0_i32_0 = arith.constant 0 : i32
    %2 = arith.cmpi ne, %1, %c0_i32_0 : i32
    scf.if %2 {
      %c0_10 = arith.constant 0 : index
      %c0_11 = arith.constant 0 : index
      %12 = vector.load %arg5[%c0_10, %c0_11] : memref<1x128xf32, #tpu.memory_space<vmem>>, vector<1x128xf32>
      %13 = vector.shape_cast %12 : vector<1x128xf32> to vector<1x128xf32>
      %14 = vector.broadcast %13 : vector<1x128xf32> to vector<128x128xf32>
      %c0_12 = arith.constant 0 : index
      %c0_13 = arith.constant 0 : index
      %15 = vector.load %arg8[%c0_12, %c0_13] : memref<128x128xf32, #tpu.memory_space<vmem>>, vector<128x128xf32>
      tpu.vector_store %arg8[%c0_12, %c0_13], %14 {strides = array<i32>} : memref<128x128xf32, #tpu.memory_space<vmem>>, vector<128x128xf32>,
    } else {
    }
    %c0 = arith.constant 0 : index
    %c0_1 = arith.constant 0 : index
    %3 = vector.load %arg8[%c0, %c0_1] : memref<128x128xf32, #tpu.memory_space<vmem>>, vector<128x128xf32>
    %c0_2 = arith.constant 0 : index
    %c0_3 = arith.constant 0 : index
    %4 = vector.load %arg3[%c0_2, %c0_3] : memref<128x1152xbf16, #tpu.memory_space<vmem>>, vector<128x1152xbf16>
    %c0_4 = arith.constant 0 : index
    %c0_5 = arith.constant 0 : index
    %5 = vector.load %arg4[%c0_4, %c0_5] : memref<1152x128xbf16, #tpu.memory_space<vmem>>, vector<1152x128xbf16>
    %cst = arith.constant dense<0.000000e+00> : vector<128x128xf32>
    %6 = tpu.matmul %4, %5, %cst {dimension_numbers = #tpu.dot_dimension_numbers<[1], [0], [0], [1], [0, 0, 1, 1], [], []>} : vector<128x1152xbf16>, vector<1152x128xbf16>, vector<128x128xf32> -> vector<128x128xf32>
    %7 = arith.addf %3, %6 : vector<128x128xf32>
    %c0_6 = arith.constant 0 : index
    %c0_7 = arith.constant 0 : index
    %8 = vector.load %arg8[%c0_6, %c0_7] : memref<128x128xf32, #tpu.memory_space<vmem>>, vector<128x128xf32>
    tpu.vector_store %arg8[%c0_6, %c0_7], %7 {strides = array<i32>} : memref<128x128xf32, #tpu.memory_space<vmem>>, vector<128x128xf32>,
    %c0_i32_8 = arith.constant 0 : i32
    %9 = arith.cmpi eq, %arg2, %c0_i32_8 : i32
    %10 = arith.extui %9 : i1 to i32
    %c0_i32_9 = arith.constant 0 : i32
    %11 = arith.cmpi ne, %10, %c0_i32_9 : i32
    scf.if %11 {
      %c0_10 = arith.constant 0 : index
      %c0_11 = arith.constant 0 : index
      %12 = vector.load %arg8[%c0_10, %c0_11] : memref<128x128xf32, #tpu.memory_space<vmem>>, vector<128x128xf32>
      %c0_12 = arith.constant 0 : index
      %c0_13 = arith.constant 0 : index
      %13 = vector.load %arg6[%c0_12, %c0_13] : memref<128x128xbf16, #tpu.memory_space<vmem>>, vector<128x128xbf16>
      %14 = arith.extf %13 : vector<128x128xbf16> to vector<128x128xf32>
      %15 = arith.addf %12, %14 : vector<128x128xf32>
      %cst_14 = arith.constant 0.000000e+00 : f32
      %16 = vector.broadcast %cst_14 : f32 to vector<128x128xf32>
      %17 = arith.maximumf %15, %16 : vector<128x128xf32>
      %c0_15 = arith.constant 0 : index
      %c0_16 = arith.constant 0 : index
      %18 = vector.load %arg7[%c0_15, %c0_16] : memref<128x128xf32, #tpu.memory_space<vmem>>, vector<128x128xf32>
      tpu.vector_store %arg7[%c0_15, %c0_16], %17 {strides = array<i32>} : memref<128x128xf32, #tpu.memory_space<vmem>>, vector<128x128xf32>,
    } else {
    }
    return
  }
  func.func @transform_0(%arg0: i32, %arg1: i32, %arg2: i32) -> (i32, i32) {
    %c0_i32 = arith.constant 0 : i32
    return %arg0, %arg2 : i32, i32
  }
  func.func @transform_1(%arg0: i32, %arg1: i32, %arg2: i32) -> (i32, i32) {
    %c0_i32 = arith.constant 0 : i32
    return %arg2, %arg1 : i32, i32
  }
  func.func @transform_2(%arg0: i32, %arg1: i32, %arg2: i32) -> (i32, i32) {
    %c0_i32 = arith.constant 0 : i32
    %c0_i32_0 = arith.constant 0 : i32
    return %c0_i32, %arg1 : i32, i32
  }
  func.func @transform_3(%arg0: i32, %arg1: i32, %arg2: i32) -> (i32, i32) {
    %c0_i32 = arith.constant 0 : i32
    return %arg0, %arg1 : i32, i32
  }
  func.func @transform_4(%arg0: i32, %arg1: i32, %arg2: i32) -> (i32, i32) {
    %c0_i32 = arith.constant 0 : i32
    return %arg0, %arg1 : i32, i32
  }
}

</mosaic_0001>

<bundles_post_ra>
// kernel: basic_block_forward.3
= control target key start
LH: loop header
LB: loop body
LE: loop exit
PB: predicated region body
PF: predicated region fallthrough
CT: control target
= control target key end

     0   :  { %vm134_vm0 = vcmask 293888   ;;  %vm159_vm1 = vcmask 1041408   ;;  %s650_s1 = inlined_call_operand.vmem [shape: bf16[36,128], index: 1, kind: input, shape index: {}]   ;;  %s651_s0 = inlined_call_operand.vmem [shape: bf16[128,36], index: 0, kind: input, shape index: {}]   ;;  %s652_s2 = inlined_call_operand.vmem [shape: f32[1,128], index: 2, kind: input, shape index: {}]   ;;  %s653_s3 = inlined_call_operand.vmem [shape: bf16[128,128], index: 3, kind: output, shape index: {}]  }
   0x1   :  { %v551_v0 = vld [vmem:[%s650_s1] sm:$0xff]   ;;  %v552_v1 = vld [vmem:[%s650_s1 + $0x8] sm:$0xff]   ;;  %v553_v2 = vld [vmem:[%s650_s1 + $0x10] ss:$0 sps:$4 sm:$0x33]  }
   0x2   :  { %521 = vmatprep.subr.bf16.mxu0 %v551_v0  ;;  %543 = vmatprep.subr.bf16.mxu1 %v551_v0  ;;  %v554_v3 = vld [vmem:[%s651_s0] sm:$0xff]   ;;  %v161_v5 = vsel %vm159_vm1, %v553_v2, 0  ;;  %v556_v6 = vld [vmem:[%s651_s0 + $0x8] sm:$0xff]   ;;  %v558_v8 = vld [vmem:[%s651_s0 + $0x10] sm:$0xff]  }
   0x3   :  { %522 = vmatpush3.bf16.msra.mxu0 %v551_v0  ;;  %546 = vmatpush3.bf16.msra.mxu1 %v551_v0  ;;  %v555_v4 = vld [vmem:[%s651_s0 + $0x20] sm:$0xff]   ;;  %v557_v7 = vld [vmem:[%s651_s0 + $0x28] sm:$0xff]   ;;  %v559_v9 = vld [vmem:[%s651_s0 + $0x30] sm:$0xff]  }
   0x4   :  { %523 = vmatprep.subr.bf16.mxu0 %v552_v1  ;;  %544 = vmatprep.subr.bf16.mxu1 %v552_v1  ;;  %v560_v10 = vld [vmem:[%s651_s0 + $0x18] sm:$0xff]   ;;  %v411_v12 = vld [vmem:[%s652_s2] ss:$0 sm:$0xff] }
   0x5   :  { %527 = vmatprep.mubr.msk.bf16.mxu0 %vm134_vm0, %v554_v3  ;;  %535 = vmatprep.mubr.msk.bf16.mxu1 %vm134_vm0, %v555_v4  ;;  %v561_v11 = vld [vmem:[%s651_s0 + $0x38] sm:$0xff]  }
   0x7   :  { %524 = vmatpush3.bf16.msra.mxu0 %v552_v1  ;;  %547 = vmatpush3.bf16.msra.mxu1 %v552_v1 }
   0x8   :  { %549 = vmatprep.subr.msk.bf16.mxu0 %vm159_vm1, %v553_v2  ;;  %550 = vmatprep.subr.msk.bf16.mxu1 %vm159_vm1, %v553_v2 }
   0xb   :  { %526 = vmatpush3.bf16.msra.mxu0 %v161_v5  ;;  %548 = vmatpush3.bf16.msra.mxu1 %v161_v5 }
   0xe   :  { %528 = vmatmul.mubr.msk.bf16.vlgmr.msra.gmra.mrb[0].mxu0 %vm134_vm0, %v556_v6  ;;  %536 = vmatmul.mubr.msk.bf16.vlgmr.msra.gmra.mrb[0].mxu1 %vm134_vm0, %v557_v7 }
   0xf   :  { %531 = vmatprep.mubr.msk.bf16.mxu0 %vm134_vm0, %v558_v8  ;;  %539 = vmatprep.mubr.msk.bf16.mxu1 %vm134_vm0, %v559_v9 }
  0x16   :  { %532 = vmatmul.mubr.msk.bf16.gmra.mrb[4].mxu0 %vm134_vm0, %v560_v10  ;;  %540 = vmatmul.mubr.msk.bf16.gmra.mrb[4].mxu1 %vm134_vm0, %v561_v11 }
  0xe1   :  { %v529_v13 = vpop.f32.mrb[0].mxu0  ;;  %v537_v14 = vpop.f32.mrb[0].mxu1 }
  0xe2   :  { %v262_v15 = vadd.f32 %v529_v13, %v411_v12  ;;  %v270_v16 = vadd.f32 %v537_v14, %v411_v12  ;;  %v197_v17 = vpop.f32.mrb[1].mxu0  ;;  %v229_v18 = vpop.f32.mrb[1].mxu1 }
  0xe3   :  { %v260_v19 = vadd.f32 %v411_v12, %v197_v17  ;;  %v268_v20 = vadd.f32 %v411_v12, %v229_v18  ;;  %v530_v21 = vpop.f32.mrb[2].mxu0  ;;  %v538_v22 = vpop.f32.mrb[2].mxu1 }
  0xe4   :  { %v263_v23 = vadd.f32 %v530_v21, %v411_v12  ;;  %v271_v24 = vadd.f32 %v538_v22, %v411_v12  ;;  %v200_v25 = vpop.f32.mrb[3].mxu0  ;;  %v232_v26 = vpop.f32.mrb[3].mxu1  ;;  %v313_v29 = vmax.f32 %v262_v15, 0.0  ;;  %v321_v30 = vmax.f32 %v270_v16, 0.0 }
  0xe5   :  { %v261_v27 = vadd.f32 %v411_v12, %v200_v25  ;;  %v269_v28 = vadd.f32 %v411_v12, %v232_v26  ;;  %v311_v33 = vmax.f32 %v260_v19, 0.0  ;;  %v319_v34 = vmax.f32 %v268_v20, 0.0 }
  0xe6   :  { %v314_v31 = vmax.f32 %v263_v23, 0.0  ;;  %v322_v32 = vmax.f32 %v271_v24, 0.0 }
  0xe7   :  { %v312_v35 = vmax.f32 %v261_v27, 0.0  ;;  %v320_v36 = vmax.f32 %v269_v28, 0.0 }
  0xe8   :  { %v471_v37 = vpack.c.bf16 %v314_v31, %v313_v29  ;;  %v491_v38 = vpack.c.bf16 %v322_v32, %v321_v30 }
  0xe9   :  { %v466_v39 = vpack.c.bf16 %v312_v35, %v311_v33  ;;  %v486_v40 = vpack.c.bf16 %v320_v36, %v319_v34  ;;  %v533_v41 = vpop.f32.mrb[4].mxu0  ;;  %v541_v42 = vpop.f32.mrb[4].mxu1 }
  0xea   :  { %503 = vst [vmem:[%s653_s3 + $0x8] sm:$0xff] %v471_v37   ;;  %507 = vst [vmem:[%s653_s3 + $0x28] sm:$0xff] %v491_v38   ;;  %v266_v43 = vadd.f32 %v533_v41, %v411_v12  ;;  %v274_v44 = vadd.f32 %v541_v42, %v411_v12  ;;  %v213_v45 = vpop.f32.mrb[5].mxu0  ;;  %v245_v46 = vpop.f32.mrb[5].mxu1 }
  0xeb   :  { %467 = vst [vmem:[%s653_s3] sm:$0xff] %v466_v39   ;;  %506 = vst [vmem:[%s653_s3 + $0x20] sm:$0xff] %v486_v40   ;;  %v264_v47 = vadd.f32 %v411_v12, %v213_v45  ;;  %v272_v48 = vadd.f32 %v411_v12, %v245_v46  ;;  %v534_v49 = vpop.f32.mrb[6].mxu0  ;;  %v542_v50 = vpop.f32.mrb[6].mxu1 }
  0xec   :  { %v267_v51 = vadd.f32 %v534_v49, %v411_v12  ;;  %v275_v52 = vadd.f32 %v542_v50, %v411_v12  ;;  %v216_v53 = vpop.f32.mrb[7].mxu0  ;;  %v248_v54 = vpop.f32.mrb[7].mxu1  ;;  %v317_v57 = vmax.f32 %v266_v43, 0.0  ;;  %v325_v58 = vmax.f32 %v274_v44, 0.0 }
  0xed   :  { %v265_v55 = vadd.f32 %v411_v12, %v216_v53  ;;  %v273_v56 = vadd.f32 %v411_v12, %v248_v54  ;;  %v315_v61 = vmax.f32 %v264_v47, 0.0  ;;  %v323_v62 = vmax.f32 %v272_v48, 0.0 }
  0xee   :  { %v318_v59 = vmax.f32 %v267_v51, 0.0  ;;  %v326_v60 = vmax.f32 %v275_v52, 0.0 }
  0xef   :  { %v316_v63 = vmax.f32 %v265_v55, 0.0  ;;  %v324_v0 = vmax.f32 %v273_v56, 0.0 }
  0xf0   :  { %v481_v1 = vpack.c.bf16 %v318_v59, %v317_v57  ;;  %v501_v2 = vpack.c.bf16 %v326_v60, %v325_v58 }
  0xf1   :  { %v476_v3 = vpack.c.bf16 %v316_v63, %v315_v61  ;;  %v496_v4 = vpack.c.bf16 %v324_v0, %v323_v62 }
  0xf2   :  { %505 = vst [vmem:[%s653_s3 + $0x18] sm:$0xff] %v481_v1   ;;  %509 = vst [vmem:[%s653_s3 + $0x38] sm:$0xff] %v501_v2  }
  0xf3   :  { %504 = vst [vmem:[%s653_s3 + $0x10] sm:$0xff] %v476_v3   ;;  %508 = vst [vmem:[%s653_s3 + $0x30] sm:$0xff] %v496_v4  }

// kernel: basic_block_forward.4
= control target key start
LH: loop header
LB: loop body
LE: loop exit
PB: predicated region body
PF: predicated region fallthrough
CT: control target
= control target key end

     0   :  { %vm140_vm0 = vcmask 1041408   ;;  %vm115_vm1 = vcmask 31744   ;;  %s593_s1 = inlined_call_operand.vmem [shape: bf16[4,128], index: 1, kind: input, shape index: {}]   ;;  %s594_s0 = inlined_call_operand.vmem [shape: bf16[128,4], index: 0, kind: input, shape index: {}]   ;;  %s595_s2 = inlined_call_operand.vmem [shape: f32[1,128], index: 2, kind: input, shape index: {}]   ;;  %s596_s3 = inlined_call_operand.vmem [shape: bf16[128,128], index: 3, kind: output, shape index: {}]  }
   0x1   :  { %v74_v0 = vld [vmem:[%s593_s1] sm:$0x3]  ;;  %v505_v4 = vld [vmem:[%s594_s0 + $0x8] sm:$0xff]   ;;  %v507_v6 = vld [vmem:[%s594_s0 + $0x10] sm:$0xff]  }
   0x2   :  { %501 = vmatprep.subr.msk.bf16.mxu0 %vm140_vm0, %v74_v0  ;;  %502 = vmatprep.subr.msk.bf16.mxu1 %vm140_vm0, %v74_v0  ;;  %v142_v1 = vsel %vm140_vm0, %v74_v0, 0  ;;  %v503_v2 = vld [vmem:[%s594_s0] sm:$0xff]   ;;  %v506_v5 = vld [vmem:[%s594_s0 + $0x28] sm:$0xff]   ;;  %v508_v7 = vld [vmem:[%s594_s0 + $0x30] sm:$0xff]  }
   0x3   :  { %482 = vmatpush3.bf16.msra.mxu0 %v142_v1  ;;  %500 = vmatpush3.bf16.msra.mxu1 %v142_v1  ;;  %v504_v3 = vld [vmem:[%s594_s0 + $0x20] sm:$0xff]   ;;  %v509_v8 = vld [vmem:[%s594_s0 + $0x18] sm:$0xff]  }
   0x4   :  { %483 = vmatprep.mubr.msk.bf16.mxu0 %vm115_vm1, %v503_v2  ;;  %491 = vmatprep.mubr.msk.bf16.mxu1 %vm115_vm1, %v504_v3  ;;  %v510_v9 = vld [vmem:[%s594_s0 + $0x38] sm:$0xff]   ;;  %v376_v10 = vld [vmem:[%s595_s2] ss:$0 sm:$0xff] }
   0x6   :  { %484 = vmatmul.mubr.msk.bf16.vlgmr.msra.gmra.mrb[0].mxu0 %vm115_vm1, %v505_v4  ;;  %492 = vmatmul.mubr.msk.bf16.vlgmr.msra.gmra.mrb[0].mxu1 %vm115_vm1, %v506_v5 }
   0x7   :  { %487 = vmatprep.mubr.msk.bf16.mxu0 %vm115_vm1, %v507_v6  ;;  %495 = vmatprep.mubr.msk.bf16.mxu1 %vm115_vm1, %v508_v7 }
   0xe   :  { %488 = vmatmul.mubr.msk.bf16.gmra.mrb[4].mxu0 %vm115_vm1, %v509_v8  ;;  %496 = vmatmul.mubr.msk.bf16.gmra.mrb[4].mxu1 %vm115_vm1, %v510_v9 }
  0xd9   :  { %v485_v11 = vpop.f32.mrb[0].mxu0  ;;  %v493_v12 = vpop.f32.mrb[0].mxu1 }
  0xda   :  { %v178_v13 = vpop.f32.mrb[1].mxu0  ;;  %v210_v14 = vpop.f32.mrb[1].mxu1  ;;  %v243_v16 = vadd.f32 %v485_v11, %v376_v10  ;;  %v251_v20 = vadd.f32 %v493_v12, %v376_v10 }
  0xdb   :  { %v486_v15 = vpop.f32.mrb[2].mxu0  ;;  %v494_v18 = vpop.f32.mrb[2].mxu1  ;;  %v241_v21 = vadd.f32 %v376_v10, %v178_v13  ;;  %v249_v25 = vadd.f32 %v376_v10, %v210_v14 }
  0xdc   :  { %v244_v17 = vadd.f32 %v486_v15, %v376_v10  ;;  %v181_v19 = vpop.f32.mrb[3].mxu0  ;;  %v252_v22 = vadd.f32 %v494_v18, %v376_v10  ;;  %v213_v24 = vpop.f32.mrb[3].mxu1 }
  0xdd   :  { %v242_v23 = vadd.f32 %v376_v10, %v181_v19  ;;  %v250_v27 = vadd.f32 %v376_v10, %v213_v24 }
  0xde   :  { %v433_v26 = vpack.c.bf16 %v244_v17, %v243_v16  ;;  %v453_v28 = vpack.c.bf16 %v252_v22, %v251_v20 }
  0xdf   :  { %v428_v29 = vpack.c.bf16 %v242_v23, %v241_v21  ;;  %v448_v30 = vpack.c.bf16 %v250_v27, %v249_v25 }
  0xe0   :  { %465 = vst [vmem:[%s596_s3 + $0x8] sm:$0xff] %v433_v26   ;;  %469 = vst [vmem:[%s596_s3 + $0x28] sm:$0xff] %v453_v28  }
  0xe1   :  { %429 = vst [vmem:[%s596_s3] sm:$0xff] %v428_v29   ;;  %v489_v31 = vpop.f32.mrb[4].mxu0  ;;  %468 = vst [vmem:[%s596_s3 + $0x20] sm:$0xff] %v448_v30   ;;  %v497_v32 = vpop.f32.mrb[4].mxu1 }
  0xe2   :  { %v194_v33 = vpop.f32.mrb[5].mxu0  ;;  %v226_v34 = vpop.f32.mrb[5].mxu1  ;;  %v247_v36 = vadd.f32 %v489_v31, %v376_v10  ;;  %v255_v40 = vadd.f32 %v497_v32, %v376_v10 }
  0xe3   :  { %v490_v35 = vpop.f32.mrb[6].mxu0  ;;  %v498_v38 = vpop.f32.mrb[6].mxu1  ;;  %v245_v41 = vadd.f32 %v376_v10, %v194_v33  ;;  %v253_v45 = vadd.f32 %v376_v10, %v226_v34 }
  0xe4   :  { %v248_v37 = vadd.f32 %v490_v35, %v376_v10  ;;  %v197_v39 = vpop.f32.mrb[7].mxu0  ;;  %v256_v42 = vadd.f32 %v498_v38, %v376_v10  ;;  %v229_v44 = vpop.f32.mrb[7].mxu1 }
  0xe5   :  { %v246_v43 = vadd.f32 %v376_v10, %v197_v39  ;;  %v254_v47 = vadd.f32 %v376_v10, %v229_v44 }
  0xe6   :  { %v443_v46 = vpack.c.bf16 %v248_v37, %v247_v36  ;;  %v463_v48 = vpack.c.bf16 %v256_v42, %v255_v40 }
  0xe7   :  { %v438_v49 = vpack.c.bf16 %v246_v43, %v245_v41  ;;  %v458_v50 = vpack.c.bf16 %v254_v47, %v253_v45 }
  0xe8   :  { %467 = vst [vmem:[%s596_s3 + $0x18] sm:$0xff] %v443_v46   ;;  %471 = vst [vmem:[%s596_s3 + $0x38] sm:$0xff] %v463_v48  }
  0xe9   :  { %466 = vst [vmem:[%s596_s3 + $0x10] sm:$0xff] %v438_v49   ;;  %470 = vst [vmem:[%s596_s3 + $0x30] sm:$0xff] %v458_v50  }

// kernel: basic_block_forward.5
= control target key start
LH: loop header
LB: loop body
LE: loop exit
PB: predicated region body
PF: predicated region fallthrough
CT: control target
= control target key end

     0   :  { %s3076_s1 = inlined_call_operand.vmem [shape: bf16[1152,128], index: 1, kind: input, shape index: {}]   ;;  %s3077_s0 = inlined_call_operand.vmem [shape: bf16[128,1152], index: 0, kind: input, shape index: {}]   ;;  %s3078_s3 = inlined_call_operand.vmem [shape: bf16[128,128], index: 3, kind: input, shape index: {}]   ;;  %s3079_s2 = inlined_call_operand.vmem [shape: f32[1,128], index: 2, kind: input, shape index: {}]   ;;  %s3080_s4 = inlined_call_operand.vmem [shape: f32[128,128], index: 4, kind: output, shape index: {}]  }
   0x1   :  { %v2209_v0 = vld [vmem:[%s3076_s1 + $0x40] sm:$0xff]   ;;  %v2213_v4 = vld [vmem:[%s3076_s1 + $0x48] sm:$0xff]   ;;  %v2217_v8 = vld [vmem:[%s3076_s1 + $0x50] sm:$0xff]  }
   0x2   :  { %v2210_v1 = vld [vmem:[%s3076_s1 + $0xc0] sm:$0xff]   ;;  %1889 = vmatprep.subr.bf16.mxu0 %v2209_v0  ;;  %v2214_v5 = vld [vmem:[%s3076_s1 + $0xc8] sm:$0xff]   ;;  %v2218_v9 = vld [vmem:[%s3076_s1 + $0xd0] sm:$0xff]  }
   0x3   :  { %v2211_v2 = vld [vmem:[%s3076_s1] sm:$0xff]   ;;  %1953 = vmatprep.subr.bf16.mxu1 %v2210_v1  ;;  %v2215_v6 = vld [vmem:[%s3076_s1 + $0x8] sm:$0xff]   ;;  %v2219_v10 = vld [vmem:[%s3076_s1 + $0x10] sm:$0xff]  }
   0x4   :  { %v2212_v3 = vld [vmem:[%s3076_s1 + $0x80] sm:$0xff]   ;;  %1890 = vmatpush3.bf16.msra.mxu0 %v2211_v2  ;;  %v2216_v7 = vld [vmem:[%s3076_s1 + $0x88] sm:$0xff]   ;;  %v2220_v11 = vld [vmem:[%s3076_s1 + $0x90] sm:$0xff]  }
   0x5   :  { %1954 = vmatpush3.bf16.msra.mxu1 %v2212_v3  ;;  %1891 = vmatprep.subr.bf16.mxu0 %v2213_v4  ;;  %v2221_v12 = vld [vmem:[%s3076_s1 + $0x58] sm:$0xff]   ;;  %v2225_v16 = vld [vmem:[%s3076_s1 + $0x60] sm:$0xff]   ;;  %v2229_v20 = vld [vmem:[%s3076_s1 + $0x68] sm:$0xff]  }
   0x6   :  { %1955 = vmatprep.subr.bf16.mxu1 %v2214_v5  ;;  %v2222_v13 = vld [vmem:[%s3076_s1 + $0xd8] sm:$0xff]   ;;  %v2226_v17 = vld [vmem:[%s3076_s1 + $0xe0] sm:$0xff]   ;;  %v2230_v21 = vld [vmem:[%s3076_s1 + $0xe8] sm:$0xff]  }
   0x7   :  { %v2223_v14 = vld [vmem:[%s3076_s1 + $0x18] sm:$0xff]   ;;  %v2227_v18 = vld [vmem:[%s3076_s1 + $0x20] sm:$0xff]   ;;  %v2231_v22 = vld [vmem:[%s3076_s1 + $0x28] sm:$0xff]  }
   0x8   :  { %1892 = vmatpush3.bf16.msra.mxu0 %v2215_v6  ;;  %v2224_v15 = vld [vmem:[%s3076_s1 + $0x98] sm:$0xff]   ;;  %v2228_v19 = vld [vmem:[%s3076_s1 + $0xa0] sm:$0xff]   ;;  %v2232_v23 = vld [vmem:[%s3076_s1 + $0xa8] sm:$0xff]  }
   0x9   :  { %1956 = vmatpush3.bf16.msra.mxu1 %v2216_v7  ;;  %1893 = vmatprep.subr.bf16.mxu0 %v2217_v8  ;;  %v2233_v24 = vld [vmem:[%s3076_s1 + $0x70] sm:$0xff]   ;;  %v2237_v28 = vld [vmem:[%s3076_s1 + $0x78] sm:$0xff]   ;;  %v2241_v32 = vld [vmem:[%s3077_s0] ss:$36 sps:$4 sm:$0xff]  }
   0xa   :  { %1957 = vmatprep.subr.bf16.mxu1 %v2218_v9  ;;  %v2234_v25 = vld [vmem:[%s3076_s1 + $0xf0] sm:$0xff]   ;;  %v2238_v29 = vld [vmem:[%s3076_s1 + $0xf8] sm:$0xff]   ;;  %v2243_v33 = vld [vmem:[%s3077_s0 + $0x4] ss:$36 sps:$4 sm:$0xff]  }
   0xb   :  { %v2235_v26 = vld [vmem:[%s3076_s1 + $0x30] sm:$0xff]   ;;  %v2239_v30 = vld [vmem:[%s3076_s1 + $0x38] sm:$0xff]   ;;  %v2244_v34 = vld [vmem:[%s3077_s0 + $0x8] ss:$36 sps:$4 sm:$0xff]   ;;  %1117 = vmatprep.mubr.bf16.mxu0 %v2243_v33 }
   0xc   :  { %1894 = vmatpush3.bf16.msra.mxu0 %v2219_v10  ;;  %v2236_v27 = vld [vmem:[%s3076_s1 + $0xb0] sm:$0xff]   ;;  %v2240_v31 = vld [vmem:[%s3076_s1 + $0xb8] sm:$0xff]   ;;  %v2247_v36 = vld [vmem:[%s3076_s1 + $0x140] sm:$0xff]  }
   0xd   :  { %1958 = vmatpush3.bf16.msra.mxu1 %v2220_v11  ;;  %1895 = vmatprep.subr.bf16.mxu0 %v2221_v12  ;;  %v2246_v35 = vld [vmem:[%s3077_s0 + $0xc] ss:$36 sps:$4 sm:$0xff]   ;;  %v2248_v37 = vld [vmem:[%s3076_s1 + $0x1c0] sm:$0xff]   ;;  %v2253_v41 = vld [vmem:[%s3077_s0 + $0x54] ss:$36 sps:$4 sm:$0xff]  }
   0xe   :  { %1959 = vmatprep.subr.bf16.mxu1 %v2222_v13  ;;  %1214 = vmatprep.mubr.bf16.mxu1 %v2246_v35  ;;  %v2249_v38 = vld [vmem:[%s3076_s1 + $0x100] sm:$0xff]   ;;  %v2251_v40 = vld [vmem:[%s3077_s0 + $0x4c] ss:$36 sps:$4 sm:$0xff]   ;;  %v2261_v48 = vld [vmem:[%s3077_s0 + $0x94] ss:$36 sps:$4 sm:$0xff]  }
   0xf   :  { %v2250_v39 = vld [vmem:[%s3076_s1 + $0x180] sm:$0xff]   ;;  %v2255_v42 = vld [vmem:[%s3077_s0 + $0x48] ss:$36 sps:$4 sm:$0xff]   ;;  %v2256_v43 = vld [vmem:[%s3077_s0 + $0x50] ss:$36 sps:$4 sm:$0xff]  }
  0x10   :  { %1896 = vmatpush3.bf16.msra.mxu0 %v2223_v14  ;;  %v2257_v44 = vld [vmem:[%s3076_s1 + $0x148] sm:$0xff]   ;;  %v2263_v49 = vld [vmem:[%s3077_s0 + $0x9c] ss:$36 sps:$4 sm:$0xff]   ;;  %v2265_v50 = vld [vmem:[%s3077_s0 + $0x90] ss:$36 sps:$4 sm:$0xff]  }
  0x11   :  { %1960 = vmatpush3.bf16.msra.mxu1 %v2224_v15  ;;  %1897 = vmatprep.subr.bf16.mxu0 %v2225_v16  ;;  %v2258_v45 = vld [vmem:[%s3076_s1 + $0x1c8] sm:$0xff]   ;;  %v2266_v51 = vld [vmem:[%s3077_s0 + $0x98] ss:$36 sps:$4 sm:$0xff]   ;;  %v2267_v52 = vld [vmem:[%s3076_s1 + $0x150] sm:$0xff]  }
  0x12   :  { %1961 = vmatprep.subr.bf16.mxu1 %v2226_v17  ;;  %v2259_v46 = vld [vmem:[%s3076_s1 + $0x108] sm:$0xff]   ;;  %v2268_v53 = vld [vmem:[%s3076_s1 + $0x1d0] sm:$0xff]   ;;  %v2271_v56 = vld [vmem:[%s3077_s0 + $0xdc] ss:$36 sps:$4 sm:$0xff]  }
  0x13   :  { %v2260_v47 = vld [vmem:[%s3076_s1 + $0x188] sm:$0xff]   ;;  %v2269_v54 = vld [vmem:[%s3076_s1 + $0x110] sm:$0xff]   ;;  %v2275_v58 = vld [vmem:[%s3077_s0 + $0xd8] ss:$36 sps:$4 sm:$0xff]  }
  0x14   :  { %1898 = vmatpush3.bf16.msra.mxu0 %v2227_v18  ;;  %v2270_v55 = vld [vmem:[%s3076_s1 + $0x190] sm:$0xff]   ;;  %v2273_v57 = vld [vmem:[%s3077_s0 + $0xe4] ss:$36 sps:$4 sm:$0xff]   ;;  %v2277_v60 = vld [vmem:[%s3076_s1 + $0x158] sm:$0xff]  }
  0x15   :  { %1962 = vmatpush3.bf16.msra.mxu1 %v2228_v19  ;;  %1899 = vmatprep.subr.bf16.mxu0 %v2229_v20  ;;  %v2276_v59 = vld [vmem:[%s3077_s0 + $0xe0] ss:$36 sps:$4 sm:$0xff]   ;;  %v2278_v61 = vld [vmem:[%s3076_s1 + $0x1d8] sm:$0xff]   ;;  %v2283_v1 = vld [vmem:[%s3077_s0 + $0x12c] ss:$36 sps:$4 sm:$0xff]  }
  0x16   :  { %1963 = vmatprep.subr.bf16.mxu1 %v2230_v21  ;;  %v2279_v62 = vld [vmem:[%s3076_s1 + $0x118] sm:$0xff]   ;;  %v2281_v0 = vld [vmem:[%s3077_s0 + $0x124] ss:$36 sps:$4 sm:$0xff]   ;;  %v2291_v8 = vld [vmem:[%s3077_s0 + $0x16c] ss:$36 sps:$4 sm:$0xff]  }
  0x17   :  { %v2280_v63 = vld [vmem:[%s3076_s1 + $0x198] sm:$0xff]   ;;  %v2285_v2 = vld [vmem:[%s3077_s0 + $0x120] ss:$36 sps:$4 sm:$0xff]   ;;  %v2286_v4 = vld [vmem:[%s3077_s0 + $0x128] ss:$36 sps:$4 sm:$0xff]  }
  0x18   :  { %1900 = vmatpush3.bf16.msra.mxu0 %v2231_v22  ;;  %v2287_v3 = vld [vmem:[%s3076_s1 + $0x160] sm:$0xff]   ;;  %v2293_v9 = vld [vmem:[%s3077_s0 + $0x174] ss:$36 sps:$4 sm:$0xff]   ;;  %v2297_v10 = vld [vmem:[%s3076_s1 + $0x168] sm:$0xff]  }
  0x19   :  { %1964 = vmatpush3.bf16.msra.mxu1 %v2232_v23  ;;  %1901 = vmatprep.subr.bf16.mxu0 %v2233_v24  ;;  %v2288_v5 = vld [vmem:[%s3076_s1 + $0x1e0] sm:$0xff]   ;;  %v2298_v11 = vld [vmem:[%s3076_s1 + $0x1e8] sm:$0xff]   ;;  %v2296_v15 = vld [vmem:[%s3077_s0 + $0x170] ss:$36 sps:$4 sm:$0xff]  }
  0x1a   :  { %1965 = vmatprep.subr.bf16.mxu1 %v2234_v25  ;;  %v2289_v6 = vld [vmem:[%s3076_s1 + $0x120] sm:$0xff]   ;;  %v2295_v12 = vld [vmem:[%s3077_s0 + $0x168] ss:$36 sps:$4 sm:$0xff]   ;;  %v2301_v16 = vld [vmem:[%s3077_s0 + $0x1b4] ss:$36 sps:$4 sm:$0xff]  }
  0x1b   :  { %v2290_v7 = vld [vmem:[%s3076_s1 + $0x1a0] sm:$0xff]   ;;  %v2299_v13 = vld [vmem:[%s3076_s1 + $0x128] sm:$0xff]   ;;  %v2307_v18 = vld [vmem:[%s3076_s1 + $0x170] sm:$0xff]  }
  0x1c   :  { %1902 = vmatpush3.bf16.msra.mxu0 %v2235_v26  ;;  %v2300_v14 = vld [vmem:[%s3076_s1 + $0x1a8] sm:$0xff]   ;;  %v2303_v17 = vld [vmem:[%s3077_s0 + $0x1bc] ss:$36 sps:$4 sm:$0xff]   ;;  %v2308_v19 = vld [vmem:[%s3076_s1 + $0x1f0] sm:$0xff]  }
  0x1d   :  { %1966 = vmatpush3.bf16.msra.mxu1 %v2236_v27  ;;  %1903 = vmatprep.subr.bf16.mxu0 %v2237_v28  ;;  %v2309_v20 = vld [vmem:[%s3076_s1 + $0x130] sm:$0xff]   ;;  %v2306_v23 = vld [vmem:[%s3077_s0 + $0x1b8] ss:$36 sps:$4 sm:$0xff]   ;;  %v2313_v25 = vld [vmem:[%s3077_s0 + $0x204] ss:$36 sps:$4 sm:$0xff]  }
  0x1e   :  { %1967 = vmatprep.subr.bf16.mxu1 %v2238_v29  ;;  %v2310_v21 = vld [vmem:[%s3076_s1 + $0x1b0] sm:$0xff]   ;;  %v2311_v24 = vld [vmem:[%s3077_s0 + $0x1fc] ss:$36 sps:$4 sm:$0xff]  }
  0x1f   :  { %v2305_v22 = vld [vmem:[%s3077_s0 + $0x1b0] ss:$36 sps:$4 sm:$0xff]   ;;  %v2317_v26 = vld [vmem:[%s3076_s1 + $0x178] sm:$0xff]  }
  0x20   :  { %1904 = vmatpush3.bf16.msra.mxu0 %v2239_v30  ;;  %v2318_v27 = vld [vmem:[%s3076_s1 + $0x1f8] sm:$0xff]   ;;  %v2321_v35 = vld [vmem:[%s3077_s0 + $0x10] ss:$36 sps:$4 sm:$0xff]  }
  0x21   :  { %1968 = vmatpush3.bf16.msra.mxu1 %v2240_v31  ;;  %2017 = vmatprep.subr.bf16.mxu0 %v2247_v36  ;;  %v2319_v28 = vld [vmem:[%s3076_s1 + $0x138] sm:$0xff]   ;;  %v2316_v31 = vld [vmem:[%s3077_s0 + $0x200] ss:$36 sps:$4 sm:$0xff]  }
  0x22   :  { %2081 = vmatprep.subr.bf16.mxu1 %v2248_v37  ;;  %v2320_v29 = vld [vmem:[%s3076_s1 + $0x1b8] sm:$0xff]  }
  0x23   :  { %1118 = vmatmul.mubr.bf16.vlgmr.msra.gmra.mrb[0].mxu0 %v2241_v32  ;;  %v2315_v30 = vld [vmem:[%s3077_s0 + $0x1f8] ss:$36 sps:$4 sm:$0xff]   ;;  %v2327_v32 = vld [vmem:[%s3076_s1 + $0x200] sm:$0xff]  }
  0x24   :  { %1215 = vmatmul.mubr.bf16.vlgmr.msra.gmra.mrb[0].mxu1 %v2244_v34  ;;  %2018 = vmatpush3.bf16.msra.mxu0 %v2249_v38  ;;  %v2323_v33 = vld [vmem:[%s3077_s0 + $0x14] ss:$36 sps:$4 sm:$0xff]   ;;  %v2326_v34 = vld [vmem:[%s3077_s0 + $0x1c] ss:$36 sps:$4 sm:$0xff]   ;;  %v2330_v38 = vld [vmem:[%s3077_s0 + $0x64] ss:$36 sps:$4 sm:$0xff]  }
  0x25   :  { %2082 = vmatpush3.bf16.msra.mxu1 %v2250_v39  ;;  %1125 = vmatprep.mubr.bf16.mxu0 %v2251_v40  ;;  %v2324_v36 = vld [vmem:[%s3077_s0 + $0x18] ss:$36 sps:$4 sm:$0xff]   ;;  %v2334_v39 = vld [vmem:[%s3076_s1 + $0x208] sm:$0xff]   ;;  %v2341_v40 = vld [vmem:[%s3076_s1 + $0x210] sm:$0xff]  }
  0x26   :  { %1222 = vmatprep.mubr.bf16.mxu1 %v2253_v41  ;;  %2019 = vmatprep.subr.bf16.mxu0 %v2257_v44  ;;  %v2328_v37 = vld [vmem:[%s3077_s0 + $0x5c] ss:$36 sps:$4 sm:$0xff]   ;;  %v2337_v44 = vld [vmem:[%s3077_s0 + $0xac] ss:$36 sps:$4 sm:$0xff]  }
  0x27   :  { %2083 = vmatprep.subr.bf16.mxu1 %v2258_v45  ;;  %v2332_v41 = vld [vmem:[%s3077_s0 + $0x58] ss:$36 sps:$4 sm:$0xff]  }
  0x28   :  { %2020 = vmatpush3.bf16.msra.mxu0 %v2259_v46  ;;  %v2348_v45 = vld [vmem:[%s3076_s1 + $0x218] sm:$0xff]   ;;  %v2355_v46 = vld [vmem:[%s3076_s1 + $0x220] sm:$0xff]  }
  0x29   :  { %2084 = vmatpush3.bf16.msra.mxu1 %v2260_v47  ;;  %2021 = vmatprep.subr.bf16.mxu0 %v2267_v52  ;;  %v2339_v47 = vld [vmem:[%s3077_s0 + $0xa0] ss:$36 sps:$4 sm:$0xff]   ;;  %v2346_v52 = vld [vmem:[%s3077_s0 + $0xe8] ss:$36 sps:$4 sm:$0xff]  }
  0x2a   :  { %2085 = vmatprep.subr.bf16.mxu1 %v2268_v53  ;;  %v2369_v53 = vld [vmem:[%s3076_s1 + $0x230] sm:$0xff]  }
  0x2b   :  { %1126 = vmatmul.mubr.bf16.gmra.mrb[4].mxu0 %v2255_v42  ;;  %v2333_v42 = vld [vmem:[%s3077_s0 + $0x60] ss:$36 sps:$4 sm:$0xff]  }
  0x2c   :  { %1223 = vmatmul.mubr.bf16.gmra.mrb[4].mxu1 %v2256_v43  ;;  %1133 = vmatprep.mubr.bf16.mxu0 %v2261_v48  ;;  %v2335_v43 = vld [vmem:[%s3077_s0 + $0xa4] ss:$36 sps:$4 sm:$0xff]  }
  0x2d   :  { %1230 = vmatprep.mubr.bf16.mxu1 %v2263_v49  ;;  %2022 = vmatpush3.bf16.msra.mxu0 %v2269_v54  ;;  %v2340_v48 = vld [vmem:[%s3077_s0 + $0xa8] ss:$36 sps:$4 sm:$0xff]   ;;  %v2347_v54 = vld [vmem:[%s3077_s0 + $0xf0] ss:$36 sps:$4 sm:$0xff]  }
  0x2e   :  { %2086 = vmatpush3.bf16.msra.mxu1 %v2270_v55  ;;  %2023 = vmatprep.subr.bf16.mxu0 %v2277_v60  ;;  %v2342_v49 = vld [vmem:[%s3077_s0 + $0xec] ss:$36 sps:$4 sm:$0xff]   ;;  %v2349_v55 = vld [vmem:[%s3077_s0 + $0x134] ss:$36 sps:$4 sm:$0xff]   ;;  %v2356_v60 = vld [vmem:[%s3077_s0 + $0x17c] ss:$36 sps:$4 sm:$0xff]  }
  0x2f   :  { %2087 = vmatprep.subr.bf16.mxu1 %v2278_v61  ;;  %v2358_v61 = vld [vmem:[%s3077_s0 + $0x184] ss:$36 sps:$4 sm:$0xff]  }
  0x31   :  { %2024 = vmatpush3.bf16.msra.mxu0 %v2279_v62  ;;  %v2360_v62 = vld [vmem:[%s3077_s0 + $0x178] ss:$36 sps:$4 sm:$0xff]  }
  0x32   :  { %2088 = vmatpush3.bf16.msra.mxu1 %v2280_v63  ;;  %2025 = vmatprep.subr.bf16.mxu0 %v2287_v3  ;;  %v2361_v63 = vld [vmem:[%s3077_s0 + $0x180] ss:$36 sps:$4 sm:$0xff]   ;;  %v2368_v3 = vld [vmem:[%s3077_s0 + $0x1c8] ss:$36 sps:$4 sm:$0xff]  }
  0x33   :  { %1134 = vmatmul.mubr.bf16.gmra.mrb[8].mxu0 %v2265_v50  ;;  %2089 = vmatprep.subr.bf16.mxu1 %v2288_v5  ;;  %v2344_v50 = vld [vmem:[%s3077_s0 + $0xf4] ss:$36 sps:$4 sm:$0xff]  }
  0x34   :  { %1231 = vmatmul.mubr.bf16.gmra.mrb[8].mxu1 %v2266_v51  ;;  %1141 = vmatprep.mubr.bf16.mxu0 %v2271_v56  ;;  %v2362_v51 = vld [vmem:[%s3076_s1 + $0x228] sm:$0xff]   ;;  %v2351_v56 = vld [vmem:[%s3077_s0 + $0x13c] ss:$36 sps:$4 sm:$0xff]   ;;  %v2372_v5 = vld [vmem:[%s3077_s0 + $0x214] ss:$36 sps:$4 sm:$0xff]  }
  0x35   :  { %1238 = vmatprep.mubr.bf16.mxu1 %v2273_v57  ;;  %2026 = vmatpush3.bf16.msra.mxu0 %v2289_v6  ;;  %v2376_v57 = vld [vmem:[%s3076_s1 + $0x238] sm:$0xff]   ;;  %v2374_v6 = vld [vmem:[%s3077_s0 + $0x208] ss:$36 sps:$4 sm:$0xff]  }
  0x36   :  { %2090 = vmatpush3.bf16.msra.mxu1 %v2290_v7  ;;  %2027 = vmatprep.subr.bf16.mxu0 %v2297_v10  ;;  %v2375_v7 = vld [vmem:[%s3077_s0 + $0x210] ss:$36 sps:$4 sm:$0xff]   ;;  %v2379_v10 = vld [vmem:[%s3077_s0 + $0x68] ss:$36 sps:$4 sm:$0xff]  }
  0x37   :  { %2091 = vmatprep.subr.bf16.mxu1 %v2298_v11  ;;  %v2380_v11 = vld [vmem:[%s3077_s0 + $0x188] ss:$36 sps:$4 sm:$0xff]  }
  0x39   :  { %2028 = vmatpush3.bf16.msra.mxu0 %v2299_v13  ;;  %v2382_v13 = vld [vmem:[%s3077_s0 + $0x1d0] ss:$36 sps:$4 sm:$0xff]  }
  0x3a   :  { %2092 = vmatpush3.bf16.msra.mxu1 %v2300_v14  ;;  %2029 = vmatprep.subr.bf16.mxu0 %v2307_v18  ;;  %v2383_v14 = vld [vmem:[%s3077_s0 + $0xf8] ss:$36 sps:$4 sm:$0xff]  }
  0x3b   :  { %1142 = vmatmul.mubr.bf16.gmra.mrb[12].mxu0 %v2275_v58  ;;  %2093 = vmatprep.subr.bf16.mxu1 %v2308_v19  ;;  %v2353_v58 = vld [vmem:[%s3077_s0 + $0x130] ss:$36 sps:$4 sm:$0xff]  }
  0x3c   :  { %1239 = vmatmul.mubr.bf16.gmra.mrb[12].mxu1 %v2276_v59  ;;  %1149 = vmatprep.mubr.bf16.mxu0 %v2281_v0  ;;  %v2354_v59 = vld [vmem:[%s3077_s0 + $0x138] ss:$36 sps:$4 sm:$0xff]   ;;  %v2363_v0 = vld [vmem:[%s3077_s0 + $0x1c4] ss:$36 sps:$4 sm:$0xff]  }
  0x3d   :  { %1246 = vmatprep.mubr.bf16.mxu1 %v2283_v1  ;;  %2030 = vmatpush3.bf16.msra.mxu0 %v2309_v20  ;;  %v2365_v1 = vld [vmem:[%s3077_s0 + $0x1cc] ss:$36 sps:$4 sm:$0xff]  }
  0x3e   :  { %2094 = vmatpush3.bf16.msra.mxu1 %v2310_v21  ;;  %2031 = vmatprep.subr.bf16.mxu0 %v2317_v26 }
  0x3f   :  { %2095 = vmatprep.subr.bf16.mxu1 %v2318_v27 }
  0x41   :  { %2032 = vmatpush3.bf16.msra.mxu0 %v2319_v28 }
  0x42   :  { %2096 = vmatpush3.bf16.msra.mxu1 %v2320_v29  ;;  %2161 = vmatprep.subr.bf16.mxu0 %v2327_v32 }
  0x43   :  { %1150 = vmatmul.mubr.bf16.gmra.mrb[16].mxu0 %v2285_v2  ;;  %2193 = vmatprep.subr.bf16.mxu1 %v2327_v32  ;;  %v2367_v2 = vld [vmem:[%s3077_s0 + $0x1c0] ss:$36 sps:$4 sm:$0xff]  }
  0x44   :  { %1247 = vmatmul.mubr.bf16.gmra.mrb[16].mxu1 %v2286_v4  ;;  %1157 = vmatprep.mubr.bf16.mxu0 %v2291_v8  ;;  %v2370_v4 = vld [vmem:[%s3077_s0 + $0x20c] ss:$36 sps:$4 sm:$0xff]   ;;  %v2377_v8 = vld [vmem:[%s3077_s0 + $0x20] ss:$36 sps:$4 sm:$0xff]  }
  0x45   :  { %1254 = vmatprep.mubr.bf16.mxu1 %v2293_v9  ;;  %v2378_v9 = vld [vmem:[%s3077_s0 + $0x140] ss:$36 sps:$4 sm:$0xff]  }
  0x4b   :  { %1158 = vmatmul.mubr.bf16.gmra.mrb[20].mxu0 %v2295_v12  ;;  %v2381_v12 = vld [vmem:[%s3077_s0 + $0xb0] ss:$36 sps:$4 sm:$0xff]  }
  0x4c   :  { %1255 = vmatmul.mubr.bf16.gmra.mrb[20].mxu1 %v2296_v15  ;;  %1165 = vmatprep.mubr.bf16.mxu0 %v2301_v16  ;;  %v2384_v15 = vld [vmem:[%s3077_s0 + $0x218] ss:$36 sps:$4 sm:$0xff]  }
  0x4d   :  { %1262 = vmatprep.mubr.bf16.mxu1 %v2303_v17 }
  0x53   :  { %1166 = vmatmul.mubr.bf16.gmra.mrb[24].mxu0 %v2305_v22 }
  0x54   :  { %1263 = vmatmul.mubr.bf16.gmra.mrb[24].mxu1 %v2306_v23  ;;  %1173 = vmatprep.mubr.bf16.mxu0 %v2311_v24 }
  0x55   :  { %1270 = vmatprep.mubr.bf16.mxu1 %v2313_v25 }
  0x5b   :  { %1174 = vmatmul.mubr.bf16.gmra.mrb[28].mxu0 %v2315_v30 }
  0x5c   :  { %1271 = vmatmul.mubr.bf16.gmra.mrb[28].mxu1 %v2316_v31  ;;  %1311 = vmatprep.mubr.bf16.mxu0 %v2323_v33 }
  0x5d   :  { %1408 = vmatprep.mubr.bf16.mxu1 %v2326_v34 }
  0x63   :  { %1312 = vmatmul.mubr.bf16.vlgmr.msra.gmra.mrb[32].mxu0 %v2321_v35 }
  0x64   :  { %1409 = vmatmul.mubr.bf16.vlgmr.msra.gmra.mrb[32].mxu1 %v2324_v36  ;;  %2162 = vmatpush3.bf16.msra.mxu0 %v2327_v32 }
  0x65   :  { %2201 = vmatpush3.bf16.msra.mxu1 %v2327_v32  ;;  %1319 = vmatprep.mubr.bf16.mxu0 %v2328_v37 }
  0x66   :  { %1416 = vmatprep.mubr.bf16.mxu1 %v2330_v38  ;;  %2163 = vmatprep.subr.bf16.mxu0 %v2334_v39 }
  0x67   :  { %2194 = vmatprep.subr.bf16.mxu1 %v2334_v39 }
  0x68   :  { %2164 = vmatpush3.bf16.msra.mxu0 %v2334_v39 }
  0x69   :  { %2202 = vmatpush3.bf16.msra.mxu1 %v2334_v39  ;;  %2165 = vmatprep.subr.bf16.mxu0 %v2341_v40 }
  0x6a   :  { %2195 = vmatprep.subr.bf16.mxu1 %v2341_v40 }
  0x6b   :  { %1320 = vmatmul.mubr.bf16.gmra.mrb[36].mxu0 %v2332_v41 }
  0x6c   :  { %1417 = vmatmul.mubr.bf16.gmra.mrb[36].mxu1 %v2333_v42  ;;  %1327 = vmatprep.mubr.bf16.mxu0 %v2335_v43 }
  0x6d   :  { %1424 = vmatprep.mubr.bf16.mxu1 %v2337_v44  ;;  %2166 = vmatpush3.bf16.msra.mxu0 %v2341_v40 }
  0x6e   :  { %2203 = vmatpush3.bf16.msra.mxu1 %v2341_v40  ;;  %2167 = vmatprep.subr.bf16.mxu0 %v2348_v45 }
  0x6f   :  { %2196 = vmatprep.subr.bf16.mxu1 %v2348_v45 }
  0x71   :  { %2168 = vmatpush3.bf16.msra.mxu0 %v2348_v45 }
  0x72   :  { %2204 = vmatpush3.bf16.msra.mxu1 %v2348_v45  ;;  %2169 = vmatprep.subr.bf16.mxu0 %v2355_v46 }
  0x73   :  { %1328 = vmatmul.mubr.bf16.gmra.mrb[40].mxu0 %v2339_v47  ;;  %2197 = vmatprep.subr.bf16.mxu1 %v2355_v46 }
  0x74   :  { %1425 = vmatmul.mubr.bf16.gmra.mrb[40].mxu1 %v2340_v48  ;;  %1335 = vmatprep.mubr.bf16.mxu0 %v2342_v49 }
  0x75   :  { %1432 = vmatprep.mubr.bf16.mxu1 %v2344_v50  ;;  %2170 = vmatpush3.bf16.msra.mxu0 %v2355_v46 }
  0x76   :  { %2205 = vmatpush3.bf16.msra.mxu1 %v2355_v46  ;;  %2171 = vmatprep.subr.bf16.mxu0 %v2362_v51 }
  0x77   :  { %2198 = vmatprep.subr.bf16.mxu1 %v2362_v51 }
  0x79   :  { %2172 = vmatpush3.bf16.msra.mxu0 %v2362_v51 }
  0x7a   :  { %2206 = vmatpush3.bf16.msra.mxu1 %v2362_v51  ;;  %2173 = vmatprep.subr.bf16.mxu0 %v2369_v53 }
  0x7b   :  { %1336 = vmatmul.mubr.bf16.gmra.mrb[44].mxu0 %v2346_v52  ;;  %2199 = vmatprep.subr.bf16.mxu1 %v2369_v53 }
  0x7c   :  { %1433 = vmatmul.mubr.bf16.gmra.mrb[44].mxu1 %v2347_v54  ;;  %1343 = vmatprep.mubr.bf16.mxu0 %v2349_v55 }
  0x7d   :  { %1440 = vmatprep.mubr.bf16.mxu1 %v2351_v56  ;;  %2174 = vmatpush3.bf16.msra.mxu0 %v2369_v53 }
  0x7e   :  { %2207 = vmatpush3.bf16.msra.mxu1 %v2369_v53  ;;  %2175 = vmatprep.subr.bf16.mxu0 %v2376_v57 }
  0x7f   :  { %2200 = vmatprep.subr.bf16.mxu1 %v2376_v57 }
  0x81   :  { %2176 = vmatpush3.bf16.msra.mxu0 %v2376_v57 }
  0x82   :  { %2208 = vmatpush3.bf16.msra.mxu1 %v2376_v57 }
  0x83   :  { %1344 = vmatmul.mubr.bf16.gmra.mrb[48].mxu0 %v2353_v58 }
  0x84   :  { %1441 = vmatmul.mubr.bf16.gmra.mrb[48].mxu1 %v2354_v59  ;;  %1351 = vmatprep.mubr.bf16.mxu0 %v2356_v60 }
  0x85   :  { %1448 = vmatprep.mubr.bf16.mxu1 %v2358_v61 }
  0x8b   :  { %1352 = vmatmul.mubr.bf16.gmra.mrb[52].mxu0 %v2360_v62 }
  0x8c   :  { %1449 = vmatmul.mubr.bf16.gmra.mrb[52].mxu1 %v2361_v63  ;;  %1359 = vmatprep.mubr.bf16.mxu0 %v2363_v0 }
  0x8d   :  { %1456 = vmatprep.mubr.bf16.mxu1 %v2365_v1 }
  0x93   :  { %1360 = vmatmul.mubr.bf16.gmra.mrb[56].mxu0 %v2367_v2 }
  0x94   :  { %1457 = vmatmul.mubr.bf16.gmra.mrb[56].mxu1 %v2368_v3  ;;  %1367 = vmatprep.mubr.bf16.mxu0 %v2370_v4 }
  0x95   :  { %1464 = vmatprep.mubr.bf16.mxu1 %v2372_v5 }
  0x9b   :  { %1368 = vmatmul.mubr.bf16.gmra.mrb[60].mxu0 %v2374_v6 }
  0x9c   :  { %1465 = vmatmul.mubr.bf16.gmra.mrb[60].mxu1 %v2375_v7  ;;  %2177 = vmatprep.mubr.bf16.mxu0 %v2377_v8 }
  0x9d   :  { %2185 = vmatprep.mubr.bf16.mxu1 %v2378_v9 }
  0xa3   :  { %2178 = vmatmul.mubr.bf16.vlgmr.msra.gmra.mrb[64].mxu0 %v2379_v10 }
  0xa4   :  { %2186 = vmatmul.mubr.bf16.vlgmr.msra.gmra.mrb[64].mxu1 %v2380_v11  ;;  %2181 = vmatprep.mubr.bf16.mxu0 %v2381_v12 }
  0xa5   :  { %2189 = vmatprep.mubr.bf16.mxu1 %v2382_v13 }
  0xab   :  { %2182 = vmatmul.mubr.bf16.gmra.mrb[68].mxu0 %v2383_v14 }
  0xac   :  { %2190 = vmatmul.mubr.bf16.gmra.mrb[68].mxu1 %v2384_v15 }
  0xf6   :  { %v1905_v16 = vpop.f32.mrb[0].mxu0 }
  0xf7   :  { %v1969_v17 = vpop.f32.mrb[0].mxu1  ;;  %v1906_v18 = vpop.f32.mrb[1].mxu0 }
  0xf8   :  { %v1907_v19 = vadd.f32 %v1906_v18, %v1905_v16  ;;  %v1970_v20 = vpop.f32.mrb[1].mxu1  ;;  %v1908_v21 = vpop.f32.mrb[2].mxu0 }
  0xf9   :  { %v1971_v22 = vadd.f32 %v1970_v20, %v1969_v17  ;;  %v1972_v23 = vpop.f32.mrb[2].mxu1  ;;  %v1909_v24 = vpop.f32.mrb[3].mxu0 }
  0xfa   :  { %v1910_v25 = vadd.f32 %v1909_v24, %v1908_v21  ;;  %v1973_v26 = vpop.f32.mrb[3].mxu1 }
  0xfb   :  { %v2842_v27 = vadd.f32 %v1971_v22, %v1907_v19  ;;  %v1974_v28 = vadd.f32 %v1973_v26, %v1972_v23 }
  0xfd   :  { %v2844_v29 = vadd.f32 %v1974_v28, %v1910_v25 }
  0xfe   :  { %v1911_v30 = vpop.f32.mrb[4].mxu0 }
  0xff   :  { %v1975_v31 = vpop.f32.mrb[4].mxu1  ;;  %v1912_v32 = vpop.f32.mrb[5].mxu0 }
 0x100   :  { %v1913_v33 = vadd.f32 %v1912_v32, %v1911_v30  ;;  %v1976_v34 = vpop.f32.mrb[5].mxu1  ;;  %v1914_v35 = vpop.f32.mrb[6].mxu0 }
 0x101   :  { %v1977_v36 = vadd.f32 %v1976_v34, %v1975_v31  ;;  %v1978_v37 = vpop.f32.mrb[6].mxu1  ;;  %v1915_v38 = vpop.f32.mrb[7].mxu0 }
 0x102   :  { %v1916_v39 = vadd.f32 %v1915_v38, %v1914_v35  ;;  %v1979_v40 = vpop.f32.mrb[7].mxu1 }
 0x103   :  { %v2846_v41 = vadd.f32 %v1977_v36, %v1913_v33  ;;  %v1980_v42 = vadd.f32 %v1979_v40, %v1978_v37 }
 0x105   :  { %v2848_v43 = vadd.f32 %v1980_v42, %v1916_v39 }
 0x106   :  { %v1917_v44 = vpop.f32.mrb[8].mxu0 }
 0x107   :  { %v1981_v45 = vpop.f32.mrb[8].mxu1  ;;  %v1918_v46 = vpop.f32.mrb[9].mxu0 }
 0x108   :  { %v1919_v47 = vadd.f32 %v1918_v46, %v1917_v44  ;;  %v1982_v48 = vpop.f32.mrb[9].mxu1  ;;  %v1920_v49 = vpop.f32.mrb[10].mxu0 }
 0x109   :  { %v1983_v50 = vadd.f32 %v1982_v48, %v1981_v45  ;;  %v1984_v51 = vpop.f32.mrb[10].mxu1  ;;  %v1921_v52 = vpop.f32.mrb[11].mxu0 }
 0x10a   :  { %v1922_v53 = vadd.f32 %v1921_v52, %v1920_v49  ;;  %v1985_v54 = vpop.f32.mrb[11].mxu1 }
 0x10b   :  { %v2850_v55 = vadd.f32 %v1983_v50, %v1919_v47  ;;  %v1986_v56 = vadd.f32 %v1985_v54, %v1984_v51 }
 0x10d   :  { %v2852_v57 = vadd.f32 %v1986_v56, %v1922_v53 }
 0x10e   :  { %v1923_v58 = vpop.f32.mrb[12].mxu0 }
 0x10f   :  { %v1987_v59 = vpop.f32.mrb[12].mxu1  ;;  %v1924_v60 = vpop.f32.mrb[13].mxu0 }
 0x110   :  { %v1925_v61 = vadd.f32 %v1924_v60, %v1923_v58  ;;  %v1988_v62 = vpop.f32.mrb[13].mxu1  ;;  %v1926_v63 = vpop.f32.mrb[14].mxu0 }
 0x111   :  { %v1989_v0 = vadd.f32 %v1988_v62, %v1987_v59  ;;  %v1990_v1 = vpop.f32.mrb[14].mxu1  ;;  %v1927_v2 = vpop.f32.mrb[15].mxu0 }
 0x112   :  { %v1928_v3 = vadd.f32 %v1927_v2, %v1926_v63  ;;  %v1991_v4 = vpop.f32.mrb[15].mxu1 }
 0x113   :  { %v2854_v5 = vadd.f32 %v1989_v0, %v1925_v61  ;;  %v1992_v6 = vadd.f32 %v1991_v4, %v1990_v1 }
 0x115   :  { %v2856_v7 = vadd.f32 %v1992_v6, %v1928_v3 }
 0x116   :  { %v1929_v8 = vpop.f32.mrb[16].mxu0 }
 0x117   :  { %v1993_v9 = vpop.f32.mrb[16].mxu1  ;;  %v1930_v10 = vpop.f32.mrb[17].mxu0 }
 0x118   :  { %v1931_v11 = vadd.f32 %v1930_v10, %v1929_v8  ;;  %v1994_v12 = vpop.f32.mrb[17].mxu1  ;;  %v1932_v13 = vpop.f32.mrb[18].mxu0 }
 0x119   :  { %v1995_v14 = vadd.f32 %v1994_v12, %v1993_v9  ;;  %v1996_v15 = vpop.f32.mrb[18].mxu1  ;;  %v1933_v16 = vpop.f32.mrb[19].mxu0 }
 0x11a   :  { %v1934_v17 = vadd.f32 %v1933_v16, %v1932_v13  ;;  %v1997_v18 = vpop.f32.mrb[19].mxu1 }
 0x11b   :  { %v2858_v19 = vadd.f32 %v1995_v14, %v1931_v11  ;;  %v1998_v20 = vadd.f32 %v1997_v18, %v1996_v15 }
 0x11d   :  { %v2860_v21 = vadd.f32 %v1998_v20, %v1934_v17 }
 0x11e   :  { %v1935_v22 = vpop.f32.mrb[20].mxu0 }
 0x11f   :  { %v1999_v23 = vpop.f32.mrb[20].mxu1  ;;  %v1936_v24 = vpop.f32.mrb[21].mxu0 }
 0x120   :  { %v1937_v25 = vadd.f32 %v1936_v24, %v1935_v22  ;;  %v2000_v26 = vpop.f32.mrb[21].mxu1  ;;  %v1938_v28 = vpop.f32.mrb[22].mxu0 }
 0x121   :  { %v2001_v30 = vadd.f32 %v2000_v26, %v1999_v23  ;;  %v2002_v31 = vpop.f32.mrb[22].mxu1  ;;  %v1939_v32 = vpop.f32.mrb[23].mxu0 }
 0x122   :  { %v1940_v33 = vadd.f32 %v1939_v32, %v1938_v28  ;;  %v2003_v34 = vpop.f32.mrb[23].mxu1 }
 0x123   :  { %v2862_v35 = vadd.f32 %v2001_v30, %v1937_v25  ;;  %v2004_v36 = vadd.f32 %v2003_v34, %v2002_v31 }
 0x125   :  { %v2864_v37 = vadd.f32 %v2004_v36, %v1940_v33 }
 0x126   :  { %v1941_v38 = vpop.f32.mrb[24].mxu0 }
 0x127   :  { %v2005_v39 = vpop.f32.mrb[24].mxu1  ;;  %v1942_v40 = vpop.f32.mrb[25].mxu0 }
 0x128   :  { %v1943_v42 = vadd.f32 %v1942_v40, %v1941_v38  ;;  %v2006_v44 = vpop.f32.mrb[25].mxu1  ;;  %v1944_v45 = vpop.f32.mrb[26].mxu0 }
 0x129   :  { %v2007_v46 = vadd.f32 %v2006_v44, %v2005_v39  ;;  %v2008_v47 = vpop.f32.mrb[26].mxu1  ;;  %v1945_v48 = vpop.f32.mrb[27].mxu0 }
 0x12a   :  { %v1946_v49 = vadd.f32 %v1945_v48, %v1944_v45  ;;  %v2009_v50 = vpop.f32.mrb[27].mxu1 }
 0x12b   :  { %v2866_v51 = vadd.f32 %v2007_v46, %v1943_v42  ;;  %v2010_v52 = vadd.f32 %v2009_v50, %v2008_v47 }
 0x12d   :  { %v2868_v53 = vadd.f32 %v2010_v52, %v1946_v49 }
 0x12e   :  { %v1947_v54 = vpop.f32.mrb[28].mxu0 }
 0x12f   :  { %v2011_v56 = vpop.f32.mrb[28].mxu1  ;;  %v1948_v58 = vpop.f32.mrb[29].mxu0 }
 0x130   :  { %v1949_v59 = vadd.f32 %v1948_v58, %v1947_v54  ;;  %v2012_v60 = vpop.f32.mrb[29].mxu1  ;;  %v1950_v61 = vpop.f32.mrb[30].mxu0 }
 0x131   :  { %v2013_v62 = vadd.f32 %v2012_v60, %v2011_v56  ;;  %v2014_v63 = vpop.f32.mrb[30].mxu1  ;;  %v1951_v0 = vpop.f32.mrb[31].mxu0 }
 0x132   :  { %v1952_v1 = vadd.f32 %v1951_v0, %v1950_v61  ;;  %v2015_v2 = vpop.f32.mrb[31].mxu1 }
 0x133   :  { %v2870_v3 = vadd.f32 %v2013_v62, %v1949_v59  ;;  %v2016_v4 = vadd.f32 %v2015_v2, %v2014_v63 }
 0x135   :  { %v2872_v6 = vadd.f32 %v2016_v4, %v1952_v1 }
 0x136   :  { %v2033_v8 = vpop.f32.mrb[32].mxu0 }
 0x137   :  { %v2097_v9 = vpop.f32.mrb[32].mxu1  ;;  %v2034_v10 = vpop.f32.mrb[33].mxu0 }
 0x138   :  { %v2035_v11 = vadd.f32 %v2034_v10, %v2033_v8  ;;  %v2098_v12 = vpop.f32.mrb[33].mxu1  ;;  %v2036_v13 = vpop.f32.mrb[34].mxu0 }
 0x139   :  { %v2099_v14 = vadd.f32 %v2098_v12, %v2097_v9  ;;  %v2100_v15 = vpop.f32.mrb[34].mxu1  ;;  %v2037_v16 = vpop.f32.mrb[35].mxu0 }
 0x13a   :  { %v1314_v17 = vadd.f32 %v2035_v11, %v2842_v27  ;;  %v2038_v18 = vadd.f32 %v2037_v16, %v2036_v13  ;;  %v2101_v20 = vpop.f32.mrb[35].mxu1 }
 0x13b   :  { %v2102_v22 = vadd.f32 %v2101_v20, %v2100_v15 }
 0x13c   :  { %v1317_v23 = vadd.f32 %v2038_v18, %v2844_v29  ;;  %v2876_v24 = vadd.f32 %v2099_v14, %v1314_v17 }
 0x13e   :  { %v2039_v25 = vpop.f32.mrb[36].mxu0  ;;  %v2878_v26 = vadd.f32 %v2102_v22, %v1317_v23 }
 0x13f   :  { %v2103_v28 = vpop.f32.mrb[36].mxu1  ;;  %v2040_v30 = vpop.f32.mrb[37].mxu0 }
 0x140   :  { %v2041_v31 = vadd.f32 %v2040_v30, %v2039_v25  ;;  %v2104_v32 = vpop.f32.mrb[37].mxu1  ;;  %v2042_v33 = vpop.f32.mrb[38].mxu0 }
 0x141   :  { %v2105_v34 = vadd.f32 %v2104_v32, %v2103_v28  ;;  %v2106_v36 = vpop.f32.mrb[38].mxu1  ;;  %v2043_v38 = vpop.f32.mrb[39].mxu0 }
 0x142   :  { %v1322_v27 = vadd.f32 %v2041_v31, %v2846_v41  ;;  %v2044_v39 = vadd.f32 %v2043_v38, %v2042_v33  ;;  %v2107_v40 = vpop.f32.mrb[39].mxu1 }
 0x143   :  { %v2108_v42 = vadd.f32 %v2107_v40, %v2106_v36 }
 0x144   :  { %v1325_v29 = vadd.f32 %v2044_v39, %v2848_v43  ;;  %v2882_v44 = vadd.f32 %v2105_v34, %v1322_v27 }
 0x146   :  { %v2045_v45 = vpop.f32.mrb[40].mxu0  ;;  %v2884_v46 = vadd.f32 %v2108_v42, %v1325_v29 }
 0x147   :  { %v2109_v47 = vpop.f32.mrb[40].mxu1  ;;  %v2046_v48 = vpop.f32.mrb[41].mxu0 }
 0x148   :  { %v2047_v49 = vadd.f32 %v2046_v48, %v2045_v45  ;;  %v2110_v50 = vpop.f32.mrb[41].mxu1  ;;  %v2048_v52 = vpop.f32.mrb[42].mxu0 }
 0x149   :  { %v2111_v54 = vadd.f32 %v2110_v50, %v2109_v47  ;;  %v2112_v56 = vpop.f32.mrb[42].mxu1  ;;  %v2049_v58 = vpop.f32.mrb[43].mxu0 }
 0x14a   :  { %v1330_v41 = vadd.f32 %v2047_v49, %v2850_v55  ;;  %v2050_v59 = vadd.f32 %v2049_v58, %v2048_v52  ;;  %v2113_v60 = vpop.f32.mrb[43].mxu1 }
 0x14b   :  { %v2114_v61 = vadd.f32 %v2113_v60, %v2112_v56 }
 0x14c   :  { %v1333_v43 = vadd.f32 %v2050_v59, %v2852_v57  ;;  %v2888_v62 = vadd.f32 %v2111_v54, %v1330_v41 }
 0x14e   :  { %v2051_v63 = vpop.f32.mrb[44].mxu0  ;;  %v2890_v0 = vadd.f32 %v2114_v61, %v1333_v43 }
 0x14f   :  { %v2115_v1 = vpop.f32.mrb[44].mxu1  ;;  %v2052_v2 = vpop.f32.mrb[45].mxu0 }
 0x150   :  { %v2053_v4 = vadd.f32 %v2052_v2, %v2051_v63  ;;  %v2116_v8 = vpop.f32.mrb[45].mxu1  ;;  %v2054_v9 = vpop.f32.mrb[46].mxu0 }
 0x151   :  { %v2117_v10 = vadd.f32 %v2116_v8, %v2115_v1  ;;  %v2118_v11 = vpop.f32.mrb[46].mxu1  ;;  %v2055_v12 = vpop.f32.mrb[47].mxu0 }
 0x152   :  { %v1338_v55 = vadd.f32 %v2053_v4, %v2854_v5  ;;  %v2056_v13 = vadd.f32 %v2055_v12, %v2054_v9  ;;  %v2119_v14 = vpop.f32.mrb[47].mxu1 }
 0x153   :  { %v2120_v15 = vadd.f32 %v2119_v14, %v2118_v11 }
 0x154   :  { %v1341_v57 = vadd.f32 %v2056_v13, %v2856_v7  ;;  %v2894_v16 = vadd.f32 %v2117_v10, %v1338_v55 }
 0x156   :  { %v2057_v17 = vpop.f32.mrb[48].mxu0  ;;  %v2896_v18 = vadd.f32 %v2120_v15, %v1341_v57 }
 0x157   :  { %v2121_v20 = vpop.f32.mrb[48].mxu1  ;;  %v2058_v22 = vpop.f32.mrb[49].mxu0 }
 0x158   :  { %v2059_v23 = vadd.f32 %v2058_v22, %v2057_v17  ;;  %v2122_v25 = vpop.f32.mrb[49].mxu1  ;;  %v2060_v28 = vpop.f32.mrb[50].mxu0  ;;  %v2917_v22 = vld [vmem:[%s3078_s3 + $0x8] sm:$0xff]  }
 0x159   :  { %v2123_v30 = vadd.f32 %v2122_v25, %v2121_v20  ;;  %v2124_v31 = vpop.f32.mrb[50].mxu1  ;;  %v2061_v32 = vpop.f32.mrb[51].mxu0 }
 0x15a   :  { %v1346_v5 = vadd.f32 %v2059_v23, %v2858_v19  ;;  %v2062_v33 = vadd.f32 %v2061_v32, %v2060_v28  ;;  %v2125_v34 = vpop.f32.mrb[51].mxu1  ;;  %v2927_v28 = vld [vmem:[%s3078_s3] sm:$0xff]  }
 0x15b   :  { %v2126_v36 = vadd.f32 %v2125_v34, %v2124_v31  ;;  %v1856_v34 = vunpack.c.l.bf16 %v2917_v22 }
 0x15c   :  { %v1349_v7 = vadd.f32 %v2062_v33, %v2860_v21  ;;  %v2900_v38 = vadd.f32 %v2123_v30, %v1346_v5  ;;  %v2933_v5 = vld [vmem:[%s3078_s3 + $0x20] sm:$0xff]  }
 0x15e   :  { %v2063_v27 = vpop.f32.mrb[52].mxu0  ;;  %v2902_v39 = vadd.f32 %v2126_v36, %v1349_v7  ;;  %v2939_v36 = vld [vmem:[%s3078_s3 + $0x18] sm:$0xff]  }
 0x15f   :  { %v2127_v40 = vpop.f32.mrb[52].mxu1  ;;  %v2064_v42 = vpop.f32.mrb[53].mxu0  ;;  %v2944_v7 = vld [vmem:[%s3078_s3 + $0x38] sm:$0xff]  }
 0x160   :  { %v2065_v29 = vadd.f32 %v2064_v42, %v2063_v27  ;;  %v2128_v45 = vpop.f32.mrb[53].mxu1  ;;  %v2066_v47 = vpop.f32.mrb[54].mxu0 }
 0x161   :  { %v2129_v48 = vadd.f32 %v2128_v45, %v2127_v40  ;;  %v2130_v49 = vpop.f32.mrb[54].mxu1  ;;  %v2067_v50 = vpop.f32.mrb[55].mxu0  ;;  %v1852_v40 = vunpack.c.l.bf16 %v2927_v28  ;;  %v2959_v45 = vld [vmem:[%s3078_s3 + $0x30] sm:$0xff]  }
 0x162   :  { %v1354_v19 = vadd.f32 %v2065_v29, %v2862_v35  ;;  %v2068_v52 = vadd.f32 %v2067_v50, %v2066_v47  ;;  %v2131_v54 = vpop.f32.mrb[55].mxu1  ;;  %v2954_v29 = vld [vmem:[%s3078_s3 + $0x10] sm:$0xff]   ;;  %v1868_v47 = vunpack.c.l.bf16 %v2933_v5  ;;  %v2968_v50 = vld [vmem:[%s3079_s2] ss:$0 sm:$0xff] }
 0x163   :  { %v2132_v56 = vadd.f32 %v2131_v54, %v2130_v49  ;;  %v1853_v49 = vunpack.c.h.bf16 %v2927_v28  ;;  %v1864_v54 = vunpack.c.l.bf16 %v2939_v36 }
 0x164   :  { %v1357_v21 = vadd.f32 %v2068_v52, %v2864_v37  ;;  %v1451_v58 = vadd.f32 %v2129_v48, %v1354_v19  ;;  %v1869_v52 = vunpack.c.h.bf16 %v2933_v5 }
 0x166   :  { %v2069_v41 = vpop.f32.mrb[56].mxu0  ;;  %v2906_v59 = vadd.f32 %v2132_v56, %v1357_v21  ;;  %v1880_v56 = vunpack.c.l.bf16 %v2944_v7 }
 0x167   :  { %v2133_v60 = vpop.f32.mrb[56].mxu1  ;;  %v2070_v61 = vpop.f32.mrb[57].mxu0 }
 0x168   :  { %v2071_v43 = vadd.f32 %v2070_v61, %v2069_v41  ;;  %v2134_v63 = vpop.f32.mrb[57].mxu1  ;;  %v2072_v1 = vpop.f32.mrb[58].mxu0 }
 0x169   :  { %v2135_v2 = vadd.f32 %v2134_v63, %v2133_v60  ;;  %v2136_v4 = vpop.f32.mrb[58].mxu1  ;;  %v2073_v8 = vpop.f32.mrb[59].mxu0  ;;  %v1876_v63 = vunpack.c.l.bf16 %v2959_v45 }
 0x16a   :  { %v1362_v9 = vadd.f32 %v2071_v43, %v2866_v51  ;;  %v2074_v35 = vadd.f32 %v2073_v8, %v2072_v1  ;;  %v2137_v10 = vpop.f32.mrb[59].mxu1  ;;  %v1860_v43 = vunpack.c.l.bf16 %v2954_v29  ;;  %v1865_v1 = vunpack.c.h.bf16 %v2939_v36 }
 0x16b   :  { %v2138_v11 = vadd.f32 %v2137_v10, %v2136_v4  ;;  %v1861_v10 = vunpack.c.h.bf16 %v2954_v29 }
 0x16c   :  { %v1365_v12 = vadd.f32 %v2074_v35, %v2868_v53  ;;  %v2910_v37 = vadd.f32 %v2135_v2, %v1362_v9  ;;  %v2922_v53 = vld [vmem:[%s3078_s3 + $0x28] sm:$0xff]   ;;  %v1881_v35 = vunpack.c.h.bf16 %v2944_v7 }
 0x16d   :  { %v1872_v27 = vunpack.c.l.bf16 %v2922_v53  ;;  %v1873_v48 = vunpack.c.h.bf16 %v2922_v53 }
 0x16e   :  { %v2075_v55 = vpop.f32.mrb[60].mxu0  ;;  %v2912_v13 = vadd.f32 %v2138_v11, %v1365_v12 }
 0x16f   :  { %v2139_v14 = vpop.f32.mrb[60].mxu1  ;;  %v2076_v15 = vpop.f32.mrb[61].mxu0 }
 0x170   :  { %v2077_v57 = vadd.f32 %v2076_v15, %v2075_v55  ;;  %v2140_v17 = vpop.f32.mrb[61].mxu1  ;;  %v2078_v20 = vpop.f32.mrb[62].mxu0  ;;  %v1877_v15 = vunpack.c.h.bf16 %v2959_v45 }
 0x171   :  { %v2141_v51 = vadd.f32 %v2140_v17, %v2139_v14  ;;  %v2142_v23 = vpop.f32.mrb[62].mxu1  ;;  %v2079_v25 = vpop.f32.mrb[63].mxu0 }
 0x172   :  { %v1370_v30 = vadd.f32 %v2077_v57, %v2870_v3  ;;  %v2080_v31 = vadd.f32 %v2079_v25, %v2078_v20  ;;  %v2143_v32 = vpop.f32.mrb[63].mxu1 }
 0x173   :  { %v2144_v33 = vadd.f32 %v2143_v32, %v2142_v23 }
 0x174   :  { %v1373_v3 = vadd.f32 %v2080_v31, %v2872_v6  ;;  %v2949_v42 = vadd.f32 %v2141_v51, %v1370_v30  ;;  %v1857_v6 = vunpack.c.h.bf16 %v2917_v22 }
 0x176   :  { %v2179_v19 = vpop.f32.mrb[64].mxu0  ;;  %v2973_v21 = vadd.f32 %v2144_v33, %v1373_v3 }
 0x177   :  { %v1516_v41 = vadd.f32 %v2179_v19, %v2882_v44  ;;  %v2187_v60 = vpop.f32.mrb[64].mxu1  ;;  %v1507_v61 = vpop.f32.mrb[65].mxu0 }
 0x178   :  { %v1548_v2 = vadd.f32 %v2187_v60, %v1451_v58  ;;  %v1508_v4 = vadd.f32 %v1507_v61, %v2876_v24  ;;  %v1539_v8 = vpop.f32.mrb[65].mxu1  ;;  %v2180_v9 = vpop.f32.mrb[66].mxu0 }
 0x179   :  { %v1572_v11 = vadd.f32 %v2968_v50, %v1516_v41  ;;  %v1540_v44 = vadd.f32 %v1539_v8, %v2900_v38  ;;  %v1519_v12 = vadd.f32 %v2180_v9, %v2884_v46  ;;  %v2188_v55 = vpop.f32.mrb[66].mxu1  ;;  %v1510_v14 = vpop.f32.mrb[67].mxu0 }
 0x17a   :  { %v1580_v58 = vadd.f32 %v2968_v50, %v1548_v2  ;;  %v1570_v24 = vadd.f32 %v2968_v50, %v1508_v4  ;;  %v1551_v57 = vadd.f32 %v2188_v55, %v2906_v59  ;;  %v1511_v17 = vadd.f32 %v1510_v14, %v2878_v26  ;;  %v1542_v20 = vpop.f32.mrb[67].mxu1 }
 0x17b   :  { %v1655_v22 = vadd.f32 %v1856_v34, %v1572_v11  ;;  %v1578_v51 = vadd.f32 %v2968_v50, %v1540_v44  ;;  %v1573_v38 = vadd.f32 %v2968_v50, %v1519_v12  ;;  %v1543_v46 = vadd.f32 %v1542_v20, %v2902_v39 }
 0x17c   :  { %v1663_v23 = vadd.f32 %v1872_v27, %v1580_v58  ;;  %v1653_v25 = vadd.f32 %v1852_v40, %v1570_v24  ;;  %v1581_v53 = vadd.f32 %v2968_v50, %v1551_v57  ;;  %v1571_v28 = vadd.f32 %v2968_v50, %v1511_v17 }
 0x17d   :  { %v1671_v30 = vmax.f32 %v1655_v22, 0.0  ;;  %v1661_v31 = vadd.f32 %v1868_v47, %v1578_v51  ;;  %v1656_v32 = vadd.f32 %v1857_v6, %v1573_v38  ;;  %v1579_v59 = vadd.f32 %v2968_v50, %v1543_v46 }
 0x17e   :  { %v1679_v26 = vmax.f32 %v1663_v23, 0.0  ;;  %v1669_v5 = vmax.f32 %v1653_v25, 0.0  ;;  %v1664_v33 = vadd.f32 %v1873_v48, %v1581_v53  ;;  %v1654_v34 = vadd.f32 %v1853_v49, %v1571_v28  ;;  %v2183_v3 = vpop.f32.mrb[68].mxu0 }
 0x17f   :  { %1687 = vst [vmem:[%s3080_s4 + $0x10] sm:$0xff] %v1671_v30  ;;  %v1677_v39 = vmax.f32 %v1661_v31, 0.0  ;;  %v1672_v27 = vmax.f32 %v1656_v32, 0.0  ;;  %v1662_v40 = vadd.f32 %v1869_v52, %v1579_v59  ;;  %v1532_v19 = vadd.f32 %v2183_v3, %v2894_v16  ;;  %v2191_v41 = vpop.f32.mrb[68].mxu1  ;;  %v1523_v60 = vpop.f32.mrb[69].mxu0 }
 0x180   :  { %1695 = vst [vmem:[%s3080_s4 + $0x50] sm:$0xff] %v1679_v26  ;;  %1685 = vst [vmem:[%s3080_s4] sm:$0xff] %v1669_v5  ;;  %v1680_v47 = vmax.f32 %v1664_v33, 0.0  ;;  %v1670_v6 = vmax.f32 %v1654_v34, 0.0  ;;  %v1564_v48 = vadd.f32 %v2191_v41, %v2949_v42  ;;  %v1524_v49 = vadd.f32 %v1523_v60, %v2888_v62  ;;  %v1555_v61 = vpop.f32.mrb[69].mxu1  ;;  %v2184_v52 = vpop.f32.mrb[70].mxu0 }
 0x181   :  { %1693 = vst [vmem:[%s3080_s4 + $0x40] sm:$0xff] %v1677_v39  ;;  %1688 = vst [vmem:[%s3080_s4 + $0x18] sm:$0xff] %v1672_v27  ;;  %v1678_v16 = vmax.f32 %v1662_v40, 0.0  ;;  %v1576_v2 = vadd.f32 %v2968_v50, %v1532_v19  ;;  %v1556_v4 = vadd.f32 %v1555_v61, %v2910_v37  ;;  %v1535_v8 = vadd.f32 %v2184_v52, %v2896_v18  ;;  %v2192_v42 = vpop.f32.mrb[70].mxu1  ;;  %v1526_v9 = vpop.f32.mrb[71].mxu0 }
 0x182   :  { %1696 = vst [vmem:[%s3080_s4 + $0x58] sm:$0xff] %v1680_v47  ;;  %1686 = vst [vmem:[%s3080_s4 + $0x8] sm:$0xff] %v1670_v6  ;;  %v1584_v62 = vadd.f32 %v2968_v50, %v1564_v48  ;;  %v1574_v11 = vadd.f32 %v2968_v50, %v1524_v49  ;;  %v1567_v44 = vadd.f32 %v2192_v42, %v2973_v21  ;;  %v1558_v12 = vpop.f32.mrb[71].mxu1 }
 0x183   :  { %v1527_v37 = vadd.f32 %v1526_v9, %v2890_v0  ;;  %1694 = vst [vmem:[%s3080_s4 + $0x48] sm:$0xff] %v1678_v16  ;;  %v1659_v18 = vadd.f32 %v1864_v54, %v1576_v2  ;;  %v1582_v55 = vadd.f32 %v2968_v50, %v1556_v4  ;;  %v1577_v14 = vadd.f32 %v2968_v50, %v1535_v8 }
 0x184   :  { %v1559_v58 = vadd.f32 %v1558_v12, %v2912_v13  ;;  %v1667_v24 = vadd.f32 %v1880_v56, %v1584_v62  ;;  %v1657_v0 = vadd.f32 %v1860_v43, %v1574_v11  ;;  %v1585_v21 = vadd.f32 %v2968_v50, %v1567_v44 }
 0x185   :  { %v1575_v57 = vadd.f32 %v2968_v50, %v1527_v37  ;;  %v1675_v17 = vmax.f32 %v1659_v18, 0.0  ;;  %v1665_v54 = vadd.f32 %v1876_v63, %v1582_v55  ;;  %v1660_v20 = vadd.f32 %v1865_v1, %v1577_v14 }
 0x186   :  { %v1583_v22 = vadd.f32 %v2968_v50, %v1559_v58  ;;  %v1683_v13 = vmax.f32 %v1667_v24, 0.0  ;;  %v1673_v51 = vmax.f32 %v1657_v0, 0.0  ;;  %v1668_v56 = vadd.f32 %v1881_v35, %v1585_v21 }
 0x187   :  { %v1658_v43 = vadd.f32 %v1861_v10, %v1575_v57  ;;  %1691 = vst [vmem:[%s3080_s4 + $0x30] sm:$0xff] %v1675_v17  ;;  %v1681_v38 = vmax.f32 %v1665_v54, 0.0  ;;  %v1676_v46 = vmax.f32 %v1660_v20, 0.0 }
 0x188   :  { %v1666_v36 = vadd.f32 %v1877_v15, %v1583_v22  ;;  %1699 = vst [vmem:[%s3080_s4 + $0x70] sm:$0xff] %v1683_v13  ;;  %1689 = vst [vmem:[%s3080_s4 + $0x20] sm:$0xff] %v1673_v51  ;;  %v1684_v7 = vmax.f32 %v1668_v56, 0.0 }
 0x189   :  { %v1674_v29 = vmax.f32 %v1658_v43, 0.0  ;;  %1697 = vst [vmem:[%s3080_s4 + $0x60] sm:$0xff] %v1681_v38  ;;  %1692 = vst [vmem:[%s3080_s4 + $0x38] sm:$0xff] %v1676_v46 }
 0x18a   :  { %v1682_v45 = vmax.f32 %v1666_v36, 0.0  ;;  %1700 = vst [vmem:[%s3080_s4 + $0x78] sm:$0xff] %v1684_v7 }
 0x18b   :  { %1690 = vst [vmem:[%s3080_s4 + $0x28] sm:$0xff] %v1674_v29 }
 0x18c   :  { %1698 = vst [vmem:[%s3080_s4 + $0x68] sm:$0xff] %v1682_v45 }

</bundles_post_ra>
